<compile_context>
chip_gen: v6e
topology: v6e:2x2x1
jax: 0.10.0
libtpu: 0.0.40
codegen_flags: <defaults>
</compile_context>

<pallas_src>
import functools

import jax
import jax.numpy as jnp
from jax.experimental import pallas as pl
from jax.experimental.pallas import tpu as pltpu


# ----------------------------------------------------------------------------
# Fused Pallas kernel: convs + attention maps + struc_att + messages + 1x1 comb
# ----------------------------------------------------------------------------

def _fused_msg_kernel(se_unf_ref, sr_unf_ref, sr_pix_ref, ch_ref,
                      wkp_se_ref, wkp_sr_ref, bkp_ref,
                      wse_ref, bse_ref, wsr_ref, bsr_ref,
                      wc3_ref, bc_ref,
                      msgf_ref, att1_ref, *, C, rank):
    pt = sr_pix_ref.shape[-1]
    sr_pix = sr_pix_ref[...]                                    # (C, pt)

    comb = None
    for d in range(3):                                          # static dilation loop
        se_u = se_unf_ref[d * 9:(d + 1) * 9, :, :]              # (9, C, pt)
        sr_u = sr_unf_ref[d * 9:(d + 1) * 9, :, :]              # (9, C, pt)
        se_flat = se_u.reshape(9 * C, pt)                       # (9C, pt)
        sr_flat = sr_u.reshape(9 * C, pt)

        # dynamic-kernel convs as lane-dense MXU matmuls: [9, 9C] @ [9C, pt]
        dyw = (jnp.dot(wkp_se_ref[d, :, :], se_flat, preferred_element_type=jnp.float32)
               + jnp.dot(wkp_sr_ref[d, :, :], sr_flat, preferred_element_type=jnp.float32)
               + bkp_ref[d, :, :])                              # (9, pt)
        kse = (jnp.dot(wse_ref[d, :, :], se_flat, preferred_element_type=jnp.float32)
               + bse_ref[d, :, :])
        ksr = (jnp.dot(wsr_ref[d, :, :], sr_flat, preferred_element_type=jnp.float32)
               + bsr_ref[d, :, :])

        # attention map terms (sum over the 9 kernel taps)
        t1 = jnp.sum(dyw[:, None, :] * se_u, axis=0)            # (C, pt)
        t2 = jnp.sum(kse[:, None, :] * se_u, axis=0)
        t3 = jnp.sum(ksr[:, None, :] * sr_u, axis=0)
        att = sr_pix * t1 + t2 + t3

        if rank > 0:
            # struc_att: output = sum_r sigmoid(ch_r . att) * ch_r * att
            # = att * (ch @ sigmoid(ch^T @ att)); rank padded with zero columns.
            ch = ch_ref[d, :, :]                                # (C, rpad)
            sp = jax.lax.dot_general(ch, att, (((0,), (0,)), ((), ())),
                                     preferred_element_type=jnp.float32)   # (rpad, pt)
            gate = jax.nn.sigmoid(sp)
            wsum = jnp.dot(ch, gate, preferred_element_type=jnp.float32)   # (C, pt)
            att = att * wsum

        if d == 0:
            att1_ref[...] = att                                 # attention_map_1 output

        msg = att * t1                                          # message_d  (C, pt)
        contrib = jnp.dot(wc3_ref[d, :, :], msg, preferred_element_type=jnp.float32)
        comb = contrib if comb is None else comb + contrib

    # 1x1 combination conv + ReLU epilogue
    msgf_ref[...] = jnp.maximum(comb + bc_ref[...], 0.0)


# ----------------------------------------------------------------------------
# Glue: unfold (index manipulation only) and weight re-layout
# ----------------------------------------------------------------------------

def unfold9(x_nchw, dilation):
    """torch.nn.functional.unfold(k=3, dilation=d, padding=d) -> [B, 9, C, H*W]."""
    B, C, H, W = x_nchw.shape
    d = dilation
    xp = jnp.pad(x_nchw, ((0, 0), (0, 0), (d, d), (d, d)))
    cols = [xp[:, :, ih * d: ih * d + H, iw * d: iw * d + W]
            for ih in range(3) for iw in range(3)]
    return jnp.stack(cols, axis=1).reshape(B, 9, C, H * W)


def _flatten_conv_weight(w):
    """[9, Cin, 3, 3] -> [9, 9*Cin] with column index = (kh*3+kw)*Cin + cin,
    matching the row ordering of unfold9 reshaped to (9*Cin, P)."""
    return w.transpose(0, 2, 3, 1).reshape(w.shape[0], -1)


def _pick_pixel_tile(P):
    if P <= 2048:
        return P
    for cand in (2048, 1024, 512, 256, 128):
        if P % cand == 0:
            return cand
    return P


# ----------------------------------------------------------------------------
# Forward pass (AttentionGatedMSG.forward)
# ----------------------------------------------------------------------------

def attention_gated_msg_forward(params, sr, se, ch_raw, rank=3):
    """sr, se: NCHW [B, C, H, W].  ch_raw: [3, rank, B, C] standard-normal draws
    (stand-in for torch.randn inside struc_att).  Returns (message_f, attention_map_1)."""
    B, C, H, W = sr.shape
    P = H * W
    dilations = (1, 4, 8)

    # unfolds for all dilations, stacked along the tap axis: [B, 27, C, P]
    se_unf = jnp.concatenate([unfold9(se, d) for d in dilations], axis=1)
    sr_unf = jnp.concatenate([unfold9(sr, d) for d in dilations], axis=1)
    sr_pix = sr.reshape(B, C, P)

    # channel-attention weights for struc_att (softmax over channels), rank padded to 8
    if rank > 0:
        rpad = ((rank + 7) // 8) * 8
        ch_sm = jax.nn.softmax(ch_raw, axis=-1)                 # (3, rank, B, C)
        ch_ag = jnp.transpose(ch_sm, (2, 0, 3, 1))              # (B, 3, C, rank)
        ch_ag = jnp.pad(ch_ag, ((0, 0), (0, 0), (0, 0), (0, rpad - rank)))
    else:
        rpad = 8
        ch_ag = jnp.zeros((B, 3, C, rpad), jnp.float32)

    # conv weights -> matmul layout.  input_concat = cat(se, sr): split kp weights
    # into the se half and the sr half so both matmuls run on the shared unfolds.
    wkp_se, wkp_sr, bkp = [], [], []
    wse, bse, wsr, bsr = [], [], [], []
    for i in range(3):
        wkp = params[f'kp{i + 1}_w']                            # (9, 2C, 3, 3)
        wkp_se.append(_flatten_conv_weight(wkp[:, :C]))
        wkp_sr.append(_flatten_conv_weight(wkp[:, C:]))
        bkp.append(params[f'kp{i + 1}_b'].reshape(9, 1))
        wse.append(_flatten_conv_weight(params[f'kse{i + 1}_w']))
        bse.append(params[f'kse{i + 1}_b'].reshape(9, 1))
        wsr.append(_flatten_conv_weight(params[f'ksr{i + 1}_w']))
        bsr.append(params[f'ksr{i + 1}_b'].reshape(9, 1))
    wkp_se = jnp.stack(wkp_se)          # (3, 9, 9C)
    wkp_sr = jnp.stack(wkp_sr)
    bkp = jnp.stack(bkp)                # (3, 9, 1)
    wse = jnp.stack(wse)
    bse = jnp.stack(bse)
    wsr = jnp.stack(wsr)
    bsr = jnp.stack(bsr)

    wc = params['comb_w'][:, :, 0, 0]                           # (C, 3C)
    wc3 = jnp.stack([wc[:, d * C:(d + 1) * C] for d in range(3)])   # (3, C, C)
    bc = params['comb_b'].reshape(C, 1)

    pt = _pick_pixel_tile(P)
    grid = (B, P // pt)

    unf_spec = pl.BlockSpec((None, 27, C, pt), lambda b, j: (b, 0, 0, j))
    pix_spec = pl.BlockSpec((None, C, pt), lambda b, j: (b, 0, j))
    ch_spec = pl.BlockSpec((None, 3, C, rpad), lambda b, j: (b, 0, 0, 0))
    wk_spec = pl.BlockSpec((3, 9, 9 * C), lambda b, j: (0, 0, 0))
    bias_spec = pl.BlockSpec((3, 9, 1), lambda b, j: (0, 0, 0))
    wc_spec = pl.BlockSpec((3, C, C), lambda b, j: (0, 0, 0))
    bc_spec = pl.BlockSpec((C, 1), lambda b, j: (0, 0))
    out_spec = pl.BlockSpec((None, C, pt), lambda b, j: (b, 0, j))

    kern = functools.partial(_fused_msg_kernel, C=C, rank=rank)
    msg_f, att1 = pl.pallas_call(
        kern,
        out_shape=(jax.ShapeDtypeStruct((B, C, P), jnp.float32),
                   jax.ShapeDtypeStruct((B, C, P), jnp.float32)),
        grid=grid,
        in_specs=[unf_spec, unf_spec, pix_spec, ch_spec,
                  wk_spec, wk_spec, bias_spec,
                  wk_spec, bias_spec, wk_spec, bias_spec,
                  wc_spec, bc_spec],
        out_specs=(out_spec, out_spec),
        compiler_params=pltpu.CompilerParams(
            dimension_semantics=("parallel", "parallel")),
    )(se_unf, sr_unf, sr_pix, ch_ag,
      wkp_se, wkp_sr, bkp, wse, bse, wsr, bsr, wc3, bc)

    return msg_f.reshape(B, C, H, W), att1.reshape(B, C, H, W)


# ----------------------------------------------------------------------------
# Pure-JAX reference (mirrors the torch module op-for-op) for the self-check
# ----------------------------------------------------------------------------

def _conv3x3_ref(x, w, b, d):
    y = jax.lax.conv_general_dilated(
        x, w, window_strides=(1, 1), padding=((d, d), (d, d)),
        rhs_dilation=(d, d), dimension_numbers=('NCHW', 'OIHW', 'NCHW'),
        precision=jax.lax.Precision.HIGHEST)
    return y + b.reshape(1, -1, 1, 1)


def reference_forward(p, sr, se, ch_raw, rank=3):
    B, C, H, W = sr.shape
    concat = jnp.concatenate([se, sr], axis=1)
    msgs, att1 = [], None
    for i, d in enumerate((1, 4, 8)):
        dyw = _conv3x3_ref(concat, p[f'kp{i + 1}_w'], p[f'kp{i + 1}_b'], d)  # (B,9,H,W)
        kse = _conv3x3_ref(se, p[f'kse{i + 1}_w'], p[f'kse{i + 1}_b'], d)
        ksr = _conv3x3_ref(sr, p[f'ksr{i + 1}_w'], p[f'ksr{i + 1}_b'], d)
        se_u = unfold9(se, d).reshape(B, 9, C, H, W)
        sr_u = unfold9(sr, d).reshape(B, 9, C, H, W)
        t1 = jnp.sum(dyw[:, :, None] * se_u, axis=1)
        t2 = jnp.sum(kse[:, :, None] * se_u, axis=1)
        t3 = jnp.sum(ksr[:, :, None] * sr_u, axis=1)
        att = sr * t1 + t2 + t3
        if rank > 0:
            out = jnp.zeros_like(att)
            for r in range(rank):
                ch = jax.nn.softmax(ch_raw[i, r], axis=-1)[:, :, None, None]  # (B,C,1,1)
                gate = jax.nn.sigmoid(jnp.sum(ch * att, axis=1, keepdims=True))
                out = out + gate * ch * att
            att = out
        if i == 0:
            att1 = att
        msgs.append(att * t1)
    msg_cat = jnp.concatenate(msgs, axis=1)
    wc = p['comb_w'][:, :, 0, 0]
    y = jnp.einsum('oc,bchw->bohw', wc, msg_cat,
                   precision=jax.lax.Precision.HIGHEST) + p['comb_b'].reshape(1, -1, 1, 1)
    return jnp.maximum(y, 0.0), att1


# ----------------------------------------------------------------------------
# Deterministic parameter init
# ----------------------------------------------------------------------------

def init_params(key, width):
    keys = iter(jax.random.split(key, 64))

    def nrm(shape, s=0.1):
        return (jax.random.normal(next(keys), shape) * s).astype(jnp.float32)

    p = {}
    for i in (1, 2, 3):
        p[f'kp{i}_w'] = nrm((9, 2 * width, 3, 3))
        p[f'kp{i}_b'] = nrm((9,))
        p[f'kse{i}_w'] = nrm((9, width, 3, 3))
        p[f'kse{i}_b'] = nrm((9,))
        p[f'ksr{i}_w'] = nrm((9, width, 3, 3))
        p[f'ksr{i}_b'] = nrm((9,))
    p['comb_w'] = nrm((width, 3 * width, 1, 1))
    p['comb_b'] = nrm((width,))
    return p


# ----------------------------------------------------------------------------
# Main
# ----------------------------------------------------------------------------

if __name__ == "__main__":
    width = 8
    B, H, W = 2, 16, 16
    rank = 3

    root = jax.random.PRNGKey(0)
    k_param, k_sr, k_se, k_ch = jax.random.split(root, 4)

    params = init_params(k_param, width)
    sr = jax.random.normal(k_sr, (B, width, H, W), dtype=jnp.float32)
    se = jax.random.normal(k_se, (B, width, H, W), dtype=jnp.float32)
    # TODO(synk): torch.randn(...).cuda() inside struc_att is replaced by this
    # deterministic jax.random draw (same distribution, not bit-identical).
    ch_raw = jax.random.normal(k_ch, (3, rank, B, width), dtype=jnp.float32)

    fwd = jax.jit(attention_gated_msg_forward, static_argnames=("rank",))
    msg_f, att1 = fwd(params, sr, se, ch_raw, rank=rank)
    msg_f = jax.block_until_ready(msg_f)
    att1 = jax.block_until_ready(att1)

    assert msg_f.shape == (B, width, H, W), msg_f.shape
    assert att1.shape == (B, width, H, W), att1.shape
    assert jnp.all(jnp.isfinite(msg_f)) and jnp.all(jnp.isfinite(att1))

    ref_msg, ref_att1 = reference_forward(params, sr, se, ch_raw, rank=rank)
    err_msg = float(jnp.max(jnp.abs(msg_f - ref_msg)))
    err_att = float(jnp.max(jnp.abs(att1 - ref_att1)))
    scale_msg = float(jnp.max(jnp.abs(ref_msg))) + 1.0
    scale_att = float(jnp.max(jnp.abs(ref_att1))) + 1.0
    assert err_msg <= 2e-3 * scale_msg, (err_msg, scale_msg)
    assert err_att <= 2e-3 * scale_att, (err_att, scale_att)

    print("KERNEL_OK")
</pallas_src>

<mosaic_0001>
module attributes {stable_mosaic.version = 11 : i64} {
  func.func @_fused_msg_kernel(%arg0: i32, %arg1: i32, %arg2: memref<1x27x8x256xf32, #tpu.memory_space<vmem>>, %arg3: memref<1x27x8x256xf32, #tpu.memory_space<vmem>>, %arg4: memref<1x8x256xf32, #tpu.memory_space<vmem>>, %arg5: memref<1x3x8x8xf32, #tpu.memory_space<vmem>>, %arg6: memref<3x9x72xf32, #tpu.memory_space<vmem>>, %arg7: memref<3x9x72xf32, #tpu.memory_space<vmem>>, %arg8: memref<3x9x1xf32, #tpu.memory_space<vmem>>, %arg9: memref<3x9x72xf32, #tpu.memory_space<vmem>>, %arg10: memref<3x9x1xf32, #tpu.memory_space<vmem>>, %arg11: memref<3x9x72xf32, #tpu.memory_space<vmem>>, %arg12: memref<3x9x1xf32, #tpu.memory_space<vmem>>, %arg13: memref<3x8x8xf32, #tpu.memory_space<vmem>>, %arg14: memref<8x1xf32, #tpu.memory_space<vmem>>, %arg15: memref<1x8x256xf32, #tpu.memory_space<vmem>>, %arg16: memref<1x8x256xf32, #tpu.memory_space<vmem>>) attributes {dimension_semantics = [#tpu.dimension_semantics<parallel>, #tpu.dimension_semantics<parallel>], iteration_bounds = array<i64: 2, 1>, scalar_prefetch = 0 : i64, scratch_operands = 0 : i64, tpu.core_type = #tpu.core_type<tc>, window_params = [{transform_indices = @transform_0, window_bounds = array<i64: 1, 27, 8, 256>}, {transform_indices = @transform_1, window_bounds = array<i64: 1, 27, 8, 256>}, {transform_indices = @transform_2, window_bounds = array<i64: 1, 8, 256>}, {transform_indices = @transform_3, window_bounds = array<i64: 1, 3, 8, 8>}, {pipeline_mode = #tpu.pipeline_mode<synchronous>, transform_indices = @transform_4, window_bounds = array<i64: 3, 9, 72>}, {pipeline_mode = #tpu.pipeline_mode<synchronous>, transform_indices = @transform_5, window_bounds = array<i64: 3, 9, 72>}, {pipeline_mode = #tpu.pipeline_mode<synchronous>, transform_indices = @transform_6, window_bounds = array<i64: 3, 9, 1>}, {pipeline_mode = #tpu.pipeline_mode<synchronous>, transform_indices = @transform_7, window_bounds = array<i64: 3, 9, 72>}, {pipeline_mode = #tpu.pipeline_mode<synchronous>, transform_indices = @transform_8, window_bounds = array<i64: 3, 9, 1>}, {pipeline_mode = #tpu.pipeline_mode<synchronous>, transform_indices = @transform_9, window_bounds = array<i64: 3, 9, 72>}, {pipeline_mode = #tpu.pipeline_mode<synchronous>, transform_indices = @transform_10, window_bounds = array<i64: 3, 9, 1>}, {pipeline_mode = #tpu.pipeline_mode<synchronous>, transform_indices = @transform_11, window_bounds = array<i64: 3, 8, 8>}, {pipeline_mode = #tpu.pipeline_mode<synchronous>, transform_indices = @transform_12, window_bounds = array<i64: 8, 1>}, {transform_indices = @transform_13, window_bounds = array<i64: 1, 8, 256>}, {transform_indices = @transform_14, window_bounds = array<i64: 1, 8, 256>}]} {
    %c0 = arith.constant 0 : index
    %c0_0 = arith.constant 0 : index
    %c0_1 = arith.constant 0 : index
    %0 = vector.load %arg4[%c0, %c0_0, %c0_1] : memref<1x8x256xf32, #tpu.memory_space<vmem>>, vector<1x8x256xf32>
    %1 = vector.shape_cast %0 : vector<1x8x256xf32> to vector<8x256xf32>
    %c0_2 = arith.constant 0 : index
    %c0_3 = arith.constant 0 : index
    %c0_4 = arith.constant 0 : index
    %c0_5 = arith.constant 0 : index
    %2 = vector.load %arg2[%c0_2, %c0_3, %c0_4, %c0_5] : memref<1x27x8x256xf32, #tpu.memory_space<vmem>>, vector<1x9x8x256xf32>
    %3 = vector.shape_cast %2 : vector<1x9x8x256xf32> to vector<9x8x256xf32>
    %c0_6 = arith.constant 0 : index
    %c0_7 = arith.constant 0 : index
    %c0_8 = arith.constant 0 : index
    %c0_9 = arith.constant 0 : index
    %4 = vector.load %arg3[%c0_6, %c0_7, %c0_8, %c0_9] : memref<1x27x8x256xf32, #tpu.memory_space<vmem>>, vector<1x9x8x256xf32>
    %5 = vector.shape_cast %4 : vector<1x9x8x256xf32> to vector<9x8x256xf32>
    %6 = vector.shape_cast %3 : vector<9x8x256xf32> to vector<72x256xf32>
    %7 = vector.shape_cast %5 : vector<9x8x256xf32> to vector<72x256xf32>
    %c0_10 = arith.constant 0 : index
    %c0_11 = arith.constant 0 : index
    %c0_12 = arith.constant 0 : index
    %8 = vector.load %arg6[%c0_10, %c0_11, %c0_12] : memref<3x9x72xf32, #tpu.memory_space<vmem>>, vector<1x9x72xf32>
    %9 = vector.shape_cast %8 : vector<1x9x72xf32> to vector<9x72xf32>
    %cst = arith.constant dense<0.000000e+00> : vector<9x256xf32>
    %10 = tpu.matmul %9, %6, %cst {dimension_numbers = #tpu.dot_dimension_numbers<[1], [0], [0], [1], [0, 0, 1, 1], [], []>} : vector<9x72xf32>, vector<72x256xf32>, vector<9x256xf32> -> vector<9x256xf32>
    %c0_13 = arith.constant 0 : index
    %c0_14 = arith.constant 0 : index
    %c0_15 = arith.constant 0 : index
    %11 = vector.load %arg7[%c0_13, %c0_14, %c0_15] : memref<3x9x72xf32, #tpu.memory_space<vmem>>, vector<1x9x72xf32>
    %12 = vector.shape_cast %11 : vector<1x9x72xf32> to vector<9x72xf32>
    %cst_16 = arith.constant dense<0.000000e+00> : vector<9x256xf32>
    %13 = tpu.matmul %12, %7, %cst_16 {dimension_numbers = #tpu.dot_dimension_numbers<[1], [0], [0], [1], [0, 0, 1, 1], [], []>} : vector<9x72xf32>, vector<72x256xf32>, vector<9x256xf32> -> vector<9x256xf32>
    %14 = arith.addf %10, %13 : vector<9x256xf32>
    %c0_17 = arith.constant 0 : index
    %c0_18 = arith.constant 0 : index
    %c0_19 = arith.constant 0 : index
    %15 = vector.load %arg8[%c0_17, %c0_18, %c0_19] : memref<3x9x1xf32, #tpu.memory_space<vmem>>, vector<1x9x1xf32>
    %16 = vector.shape_cast %15 : vector<1x9x1xf32> to vector<9x1xf32>
    %17 = vector.broadcast %16 : vector<9x1xf32> to vector<9x256xf32>
    %18 = arith.addf %14, %17 : vector<9x256xf32>
    %c0_20 = arith.constant 0 : index
    %c0_21 = arith.constant 0 : index
    %c0_22 = arith.constant 0 : index
    %19 = vector.load %arg9[%c0_20, %c0_21, %c0_22] : memref<3x9x72xf32, #tpu.memory_space<vmem>>, vector<1x9x72xf32>
    %20 = vector.shape_cast %19 : vector<1x9x72xf32> to vector<9x72xf32>
    %cst_23 = arith.constant dense<0.000000e+00> : vector<9x256xf32>
    %21 = tpu.matmul %20, %6, %cst_23 {dimension_numbers = #tpu.dot_dimension_numbers<[1], [0], [0], [1], [0, 0, 1, 1], [], []>} : vector<9x72xf32>, vector<72x256xf32>, vector<9x256xf32> -> vector<9x256xf32>
    %c0_24 = arith.constant 0 : index
    %c0_25 = arith.constant 0 : index
    %c0_26 = arith.constant 0 : index
    %22 = vector.load %arg10[%c0_24, %c0_25, %c0_26] : memref<3x9x1xf32, #tpu.memory_space<vmem>>, vector<1x9x1xf32>
    %23 = vector.shape_cast %22 : vector<1x9x1xf32> to vector<9x1xf32>
    %24 = vector.broadcast %23 : vector<9x1xf32> to vector<9x256xf32>
    %25 = arith.addf %21, %24 : vector<9x256xf32>
    %c0_27 = arith.constant 0 : index
    %c0_28 = arith.constant 0 : index
    %c0_29 = arith.constant 0 : index
    %26 = vector.load %arg11[%c0_27, %c0_28, %c0_29] : memref<3x9x72xf32, #tpu.memory_space<vmem>>, vector<1x9x72xf32>
    %27 = vector.shape_cast %26 : vector<1x9x72xf32> to vector<9x72xf32>
    %cst_30 = arith.constant dense<0.000000e+00> : vector<9x256xf32>
    %28 = tpu.matmul %27, %7, %cst_30 {dimension_numbers = #tpu.dot_dimension_numbers<[1], [0], [0], [1], [0, 0, 1, 1], [], []>} : vector<9x72xf32>, vector<72x256xf32>, vector<9x256xf32> -> vector<9x256xf32>
    %c0_31 = arith.constant 0 : index
    %c0_32 = arith.constant 0 : index
    %c0_33 = arith.constant 0 : index
    %29 = vector.load %arg12[%c0_31, %c0_32, %c0_33] : memref<3x9x1xf32, #tpu.memory_space<vmem>>, vector<1x9x1xf32>
    %30 = vector.shape_cast %29 : vector<1x9x1xf32> to vector<9x1xf32>
    %31 = vector.broadcast %30 : vector<9x1xf32> to vector<9x256xf32>
    %32 = arith.addf %28, %31 : vector<9x256xf32>
    %33 = vector.shape_cast %18 : vector<9x256xf32> to vector<9x1x256xf32>
    %34 = vector.broadcast %33 : vector<9x1x256xf32> to vector<9x8x256xf32>
    %35 = arith.mulf %34, %3 : vector<9x8x256xf32>
    %cst_34 = arith.constant dense<0.000000e+00> : vector<8x256xf32>
    %36 = vector.multi_reduction <add>, %35, %cst_34 [0] : vector<9x8x256xf32> to vector<8x256xf32>
    %37 = vector.shape_cast %25 : vector<9x256xf32> to vector<9x1x256xf32>
    %38 = vector.broadcast %37 : vector<9x1x256xf32> to vector<9x8x256xf32>
    %39 = arith.mulf %38, %3 : vector<9x8x256xf32>
    %cst_35 = arith.constant dense<0.000000e+00> : vector<8x256xf32>
    %40 = vector.multi_reduction <add>, %39, %cst_35 [0] : vector<9x8x256xf32> to vector<8x256xf32>
    %41 = vector.shape_cast %32 : vector<9x256xf32> to vector<9x1x256xf32>
    %42 = vector.broadcast %41 : vector<9x1x256xf32> to vector<9x8x256xf32>
    %43 = arith.mulf %42, %5 : vector<9x8x256xf32>
    %cst_36 = arith.constant dense<0.000000e+00> : vector<8x256xf32>
    %44 = vector.multi_reduction <add>, %43, %cst_36 [0] : vector<9x8x256xf32> to vector<8x256xf32>
    %45 = arith.mulf %1, %36 : vector<8x256xf32>
    %46 = arith.addf %45, %40 : vector<8x256xf32>
    %47 = arith.addf %46, %44 : vector<8x256xf32>
    %c0_37 = arith.constant 0 : index
    %c0_38 = arith.constant 0 : index
    %c0_39 = arith.constant 0 : index
    %c0_40 = arith.constant 0 : index
    %48 = vector.load %arg5[%c0_37, %c0_38, %c0_39, %c0_40] : memref<1x3x8x8xf32, #tpu.memory_space<vmem>>, vector<1x1x8x8xf32>
    %49 = vector.shape_cast %48 : vector<1x1x8x8xf32> to vector<8x8xf32>
    %cst_41 = arith.constant dense<0.000000e+00> : vector<8x256xf32>
    %50 = tpu.matmul %49, %47, %cst_41 {dimension_numbers = #tpu.dot_dimension_numbers<[0], [0], [1], [1], [0, 1, 1, 1], [], []>} : vector<8x8xf32>, vector<8x256xf32>, vector<8x256xf32> -> vector<8x256xf32>
    %51 = arith.negf %50 : vector<8x256xf32>
    %52 = math.exp %51 : vector<8x256xf32>
    %cst_42 = arith.constant 1.000000e+00 : f32
    %53 = vector.broadcast %cst_42 : f32 to vector<8x256xf32>
    %54 = arith.addf %53, %52 : vector<8x256xf32>
    %55 = arith.divf %53, %54 : vector<8x256xf32>
    %cst_43 = arith.constant dense<0.000000e+00> : vector<8x256xf32>
    %56 = tpu.matmul %49, %55, %cst_43 {dimension_numbers = #tpu.dot_dimension_numbers<[1], [0], [0], [1], [0, 0, 1, 1], [], []>} : vector<8x8xf32>, vector<8x256xf32>, vector<8x256xf32> -> vector<8x256xf32>
    %57 = arith.mulf %47, %56 : vector<8x256xf32>
    %c0_44 = arith.constant 0 : index
    %c0_45 = arith.constant 0 : index
    %c0_46 = arith.constant 0 : index
    %58 = vector.load %arg16[%c0_44, %c0_45, %c0_46] : memref<1x8x256xf32, #tpu.memory_space<vmem>>, vector<1x8x256xf32>
    %59 = vector.shape_cast %58 : vector<1x8x256xf32> to vector<8x256xf32>
    %60 = vector.shape_cast %57 : vector<8x256xf32> to vector<1x8x256xf32>
    tpu.vector_store %arg16[%c0_44, %c0_45, %c0_46], %60 {strides = array<i32>} : memref<1x8x256xf32, #tpu.memory_space<vmem>>, vector<1x8x256xf32>,
    %61 = arith.mulf %57, %36 : vector<8x256xf32>
    %c0_47 = arith.constant 0 : index
    %c0_48 = arith.constant 0 : index
    %c0_49 = arith.constant 0 : index
    %62 = vector.load %arg13[%c0_47, %c0_48, %c0_49] : memref<3x8x8xf32, #tpu.memory_space<vmem>>, vector<1x8x8xf32>
    %63 = vector.shape_cast %62 : vector<1x8x8xf32> to vector<8x8xf32>
    %cst_50 = arith.constant dense<0.000000e+00> : vector<8x256xf32>
    %64 = tpu.matmul %63, %61, %cst_50 {dimension_numbers = #tpu.dot_dimension_numbers<[1], [0], [0], [1], [0, 0, 1, 1], [], []>} : vector<8x8xf32>, vector<8x256xf32>, vector<8x256xf32> -> vector<8x256xf32>
    %c0_51 = arith.constant 0 : index
    %c9 = arith.constant 9 : index
    %c0_52 = arith.constant 0 : index
    %c0_53 = arith.constant 0 : index
    %65 = vector.load %arg2[%c0_51, %c9, %c0_52, %c0_53] : memref<1x27x8x256xf32, #tpu.memory_space<vmem>>, vector<1x9x8x256xf32>
    %66 = vector.shape_cast %65 : vector<1x9x8x256xf32> to vector<9x8x256xf32>
    %c0_54 = arith.constant 0 : index
    %c9_55 = arith.constant 9 : index
    %c0_56 = arith.constant 0 : index
    %c0_57 = arith.constant 0 : index
    %67 = vector.load %arg3[%c0_54, %c9_55, %c0_56, %c0_57] : memref<1x27x8x256xf32, #tpu.memory_space<vmem>>, vector<1x9x8x256xf32>
    %68 = vector.shape_cast %67 : vector<1x9x8x256xf32> to vector<9x8x256xf32>
    %69 = vector.shape_cast %66 : vector<9x8x256xf32> to vector<72x256xf32>
    %70 = vector.shape_cast %68 : vector<9x8x256xf32> to vector<72x256xf32>
    %c1 = arith.constant 1 : index
    %c0_58 = arith.constant 0 : index
    %c0_59 = arith.constant 0 : index
    %71 = vector.load %arg6[%c1, %c0_58, %c0_59] : memref<3x9x72xf32, #tpu.memory_space<vmem>>, vector<1x9x72xf32>
    %72 = vector.shape_cast %71 : vector<1x9x72xf32> to vector<9x72xf32>
    %cst_60 = arith.constant dense<0.000000e+00> : vector<9x256xf32>
    %73 = tpu.matmul %72, %69, %cst_60 {dimension_numbers = #tpu.dot_dimension_numbers<[1], [0], [0], [1], [0, 0, 1, 1], [], []>} : vector<9x72xf32>, vector<72x256xf32>, vector<9x256xf32> -> vector<9x256xf32>
    %c1_61 = arith.constant 1 : index
    %c0_62 = arith.constant 0 : index
    %c0_63 = arith.constant 0 : index
    %74 = vector.load %arg7[%c1_61, %c0_62, %c0_63] : memref<3x9x72xf32, #tpu.memory_space<vmem>>, vector<1x9x72xf32>
    %75 = vector.shape_cast %74 : vector<1x9x72xf32> to vector<9x72xf32>
    %cst_64 = arith.constant dense<0.000000e+00> : vector<9x256xf32>
    %76 = tpu.matmul %75, %70, %cst_64 {dimension_numbers = #tpu.dot_dimension_numbers<[1], [0], [0], [1], [0, 0, 1, 1], [], []>} : vector<9x72xf32>, vector<72x256xf32>, vector<9x256xf32> -> vector<9x256xf32>
    %77 = arith.addf %73, %76 : vector<9x256xf32>
    %c1_65 = arith.constant 1 : index
    %c0_66 = arith.constant 0 : index
    %c0_67 = arith.constant 0 : index
    %78 = vector.load %arg8[%c1_65, %c0_66, %c0_67] : memref<3x9x1xf32, #tpu.memory_space<vmem>>, vector<1x9x1xf32>
    %79 = vector.shape_cast %78 : vector<1x9x1xf32> to vector<9x1xf32>
    %80 = vector.broadcast %79 : vector<9x1xf32> to vector<9x256xf32>
    %81 = arith.addf %77, %80 : vector<9x256xf32>
    %c1_68 = arith.constant 1 : index
    %c0_69 = arith.constant 0 : index
    %c0_70 = arith.constant 0 : index
    %82 = vector.load %arg9[%c1_68, %c0_69, %c0_70] : memref<3x9x72xf32, #tpu.memory_space<vmem>>, vector<1x9x72xf32>
    %83 = vector.shape_cast %82 : vector<1x9x72xf32> to vector<9x72xf32>
    %cst_71 = arith.constant dense<0.000000e+00> : vector<9x256xf32>
    %84 = tpu.matmul %83, %69, %cst_71 {dimension_numbers = #tpu.dot_dimension_numbers<[1], [0], [0], [1], [0, 0, 1, 1], [], []>} : vector<9x72xf32>, vector<72x256xf32>, vector<9x256xf32> -> vector<9x256xf32>
    %c1_72 = arith.constant 1 : index
    %c0_73 = arith.constant 0 : index
    %c0_74 = arith.constant 0 : index
    %85 = vector.load %arg10[%c1_72, %c0_73, %c0_74] : memref<3x9x1xf32, #tpu.memory_space<vmem>>, vector<1x9x1xf32>
    %86 = vector.shape_cast %85 : vector<1x9x1xf32> to vector<9x1xf32>
    %87 = vector.broadcast %86 : vector<9x1xf32> to vector<9x256xf32>
    %88 = arith.addf %84, %87 : vector<9x256xf32>
    %c1_75 = arith.constant 1 : index
    %c0_76 = arith.constant 0 : index
    %c0_77 = arith.constant 0 : index
    %89 = vector.load %arg11[%c1_75, %c0_76, %c0_77] : memref<3x9x72xf32, #tpu.memory_space<vmem>>, vector<1x9x72xf32>
    %90 = vector.shape_cast %89 : vector<1x9x72xf32> to vector<9x72xf32>
    %cst_78 = arith.constant dense<0.000000e+00> : vector<9x256xf32>
    %91 = tpu.matmul %90, %70, %cst_78 {dimension_numbers = #tpu.dot_dimension_numbers<[1], [0], [0], [1], [0, 0, 1, 1], [], []>} : vector<9x72xf32>, vector<72x256xf32>, vector<9x256xf32> -> vector<9x256xf32>
    %c1_79 = arith.constant 1 : index
    %c0_80 = arith.constant 0 : index
    %c0_81 = arith.constant 0 : index
    %92 = vector.load %arg12[%c1_79, %c0_80, %c0_81] : memref<3x9x1xf32, #tpu.memory_space<vmem>>, vector<1x9x1xf32>
    %93 = vector.shape_cast %92 : vector<1x9x1xf32> to vector<9x1xf32>
    %94 = vector.broadcast %93 : vector<9x1xf32> to vector<9x256xf32>
    %95 = arith.addf %91, %94 : vector<9x256xf32>
    %96 = vector.shape_cast %81 : vector<9x256xf32> to vector<9x1x256xf32>
    %97 = vector.broadcast %96 : vector<9x1x256xf32> to vector<9x8x256xf32>
    %98 = arith.mulf %97, %66 : vector<9x8x256xf32>
    %cst_82 = arith.constant dense<0.000000e+00> : vector<8x256xf32>
    %99 = vector.multi_reduction <add>, %98, %cst_82 [0] : vector<9x8x256xf32> to vector<8x256xf32>
    %100 = vector.shape_cast %88 : vector<9x256xf32> to vector<9x1x256xf32>
    %101 = vector.broadcast %100 : vector<9x1x256xf32> to vector<9x8x256xf32>
    %102 = arith.mulf %101, %66 : vector<9x8x256xf32>
    %cst_83 = arith.constant dense<0.000000e+00> : vector<8x256xf32>
    %103 = vector.multi_reduction <add>, %102, %cst_83 [0] : vector<9x8x256xf32> to vector<8x256xf32>
    %104 = vector.shape_cast %95 : vector<9x256xf32> to vector<9x1x256xf32>
    %105 = vector.broadcast %104 : vector<9x1x256xf32> to vector<9x8x256xf32>
    %106 = arith.mulf %105, %68 : vector<9x8x256xf32>
    %cst_84 = arith.constant dense<0.000000e+00> : vector<8x256xf32>
    %107 = vector.multi_reduction <add>, %106, %cst_84 [0] : vector<9x8x256xf32> to vector<8x256xf32>
    %108 = arith.mulf %1, %99 : vector<8x256xf32>
    %109 = arith.addf %108, %103 : vector<8x256xf32>
    %110 = arith.addf %109, %107 : vector<8x256xf32>
    %c0_85 = arith.constant 0 : index
    %c1_86 = arith.constant 1 : index
    %c0_87 = arith.constant 0 : index
    %c0_88 = arith.constant 0 : index
    %111 = vector.load %arg5[%c0_85, %c1_86, %c0_87, %c0_88] : memref<1x3x8x8xf32, #tpu.memory_space<vmem>>, vector<1x1x8x8xf32>
    %112 = vector.shape_cast %111 : vector<1x1x8x8xf32> to vector<8x8xf32>
    %cst_89 = arith.constant dense<0.000000e+00> : vector<8x256xf32>
    %113 = tpu.matmul %112, %110, %cst_89 {dimension_numbers = #tpu.dot_dimension_numbers<[0], [0], [1], [1], [0, 1, 1, 1], [], []>} : vector<8x8xf32>, vector<8x256xf32>, vector<8x256xf32> -> vector<8x256xf32>
    %114 = arith.negf %113 : vector<8x256xf32>
    %115 = math.exp %114 : vector<8x256xf32>
    %cst_90 = arith.constant 1.000000e+00 : f32
    %116 = vector.broadcast %cst_90 : f32 to vector<8x256xf32>
    %117 = arith.addf %116, %115 : vector<8x256xf32>
    %118 = arith.divf %116, %117 : vector<8x256xf32>
    %cst_91 = arith.constant dense<0.000000e+00> : vector<8x256xf32>
    %119 = tpu.matmul %112, %118, %cst_91 {dimension_numbers = #tpu.dot_dimension_numbers<[1], [0], [0], [1], [0, 0, 1, 1], [], []>} : vector<8x8xf32>, vector<8x256xf32>, vector<8x256xf32> -> vector<8x256xf32>
    %120 = arith.mulf %110, %119 : vector<8x256xf32>
    %121 = arith.mulf %120, %99 : vector<8x256xf32>
    %c1_92 = arith.constant 1 : index
    %c0_93 = arith.constant 0 : index
    %c0_94 = arith.constant 0 : index
    %122 = vector.load %arg13[%c1_92, %c0_93, %c0_94] : memref<3x8x8xf32, #tpu.memory_space<vmem>>, vector<1x8x8xf32>
    %123 = vector.shape_cast %122 : vector<1x8x8xf32> to vector<8x8xf32>
    %cst_95 = arith.constant dense<0.000000e+00> : vector<8x256xf32>
    %124 = tpu.matmul %123, %121, %cst_95 {dimension_numbers = #tpu.dot_dimension_numbers<[1], [0], [0], [1], [0, 0, 1, 1], [], []>} : vector<8x8xf32>, vector<8x256xf32>, vector<8x256xf32> -> vector<8x256xf32>
    %125 = arith.addf %64, %124 : vector<8x256xf32>
    %c0_96 = arith.constant 0 : index
    %c18 = arith.constant 18 : index
    %c0_97 = arith.constant 0 : index
    %c0_98 = arith.constant 0 : index
    %126 = vector.load %arg2[%c0_96, %c18, %c0_97, %c0_98] : memref<1x27x8x256xf32, #tpu.memory_space<vmem>>, vector<1x9x8x256xf32>
    %127 = vector.shape_cast %126 : vector<1x9x8x256xf32> to vector<9x8x256xf32>
    %c0_99 = arith.constant 0 : index
    %c18_100 = arith.constant 18 : index
    %c0_101 = arith.constant 0 : index
    %c0_102 = arith.constant 0 : index
    %128 = vector.load %arg3[%c0_99, %c18_100, %c0_101, %c0_102] : memref<1x27x8x256xf32, #tpu.memory_space<vmem>>, vector<1x9x8x256xf32>
    %129 = vector.shape_cast %128 : vector<1x9x8x256xf32> to vector<9x8x256xf32>
    %130 = vector.shape_cast %127 : vector<9x8x256xf32> to vector<72x256xf32>
    %131 = vector.shape_cast %129 : vector<9x8x256xf32> to vector<72x256xf32>
    %c2 = arith.constant 2 : index
    %c0_103 = arith.constant 0 : index
    %c0_104 = arith.constant 0 : index
    %132 = vector.load %arg6[%c2, %c0_103, %c0_104] : memref<3x9x72xf32, #tpu.memory_space<vmem>>, vector<1x9x72xf32>
    %133 = vector.shape_cast %132 : vector<1x9x72xf32> to vector<9x72xf32>
    %cst_105 = arith.constant dense<0.000000e+00> : vector<9x256xf32>
    %134 = tpu.matmul %133, %130, %cst_105 {dimension_numbers = #tpu.dot_dimension_numbers<[1], [0], [0], [1], [0, 0, 1, 1], [], []>} : vector<9x72xf32>, vector<72x256xf32>, vector<9x256xf32> -> vector<9x256xf32>
    %c2_106 = arith.constant 2 : index
    %c0_107 = arith.constant 0 : index
    %c0_108 = arith.constant 0 : index
    %135 = vector.load %arg7[%c2_106, %c0_107, %c0_108] : memref<3x9x72xf32, #tpu.memory_space<vmem>>, vector<1x9x72xf32>
    %136 = vector.shape_cast %135 : vector<1x9x72xf32> to vector<9x72xf32>
    %cst_109 = arith.constant dense<0.000000e+00> : vector<9x256xf32>
    %137 = tpu.matmul %136, %131, %cst_109 {dimension_numbers = #tpu.dot_dimension_numbers<[1], [0], [0], [1], [0, 0, 1, 1], [], []>} : vector<9x72xf32>, vector<72x256xf32>, vector<9x256xf32> -> vector<9x256xf32>
    %138 = arith.addf %134, %137 : vector<9x256xf32>
    %c2_110 = arith.constant 2 : index
    %c0_111 = arith.constant 0 : index
    %c0_112 = arith.constant 0 : index
    %139 = vector.load %arg8[%c2_110, %c0_111, %c0_112] : memref<3x9x1xf32, #tpu.memory_space<vmem>>, vector<1x9x1xf32>
    %140 = vector.shape_cast %139 : vector<1x9x1xf32> to vector<9x1xf32>
    %141 = vector.broadcast %140 : vector<9x1xf32> to vector<9x256xf32>
    %142 = arith.addf %138, %141 : vector<9x256xf32>
    %c2_113 = arith.constant 2 : index
    %c0_114 = arith.constant 0 : index
    %c0_115 = arith.constant 0 : index
    %143 = vector.load %arg9[%c2_113, %c0_114, %c0_115] : memref<3x9x72xf32, #tpu.memory_space<vmem>>, vector<1x9x72xf32>
    %144 = vector.shape_cast %143 : vector<1x9x72xf32> to vector<9x72xf32>
    %cst_116 = arith.constant dense<0.000000e+00> : vector<9x256xf32>
    %145 = tpu.matmul %144, %130, %cst_116 {dimension_numbers = #tpu.dot_dimension_numbers<[1], [0], [0], [1], [0, 0, 1, 1], [], []>} : vector<9x72xf32>, vector<72x256xf32>, vector<9x256xf32> -> vector<9x256xf32>
    %c2_117 = arith.constant 2 : index
    %c0_118 = arith.constant 0 : index
    %c0_119 = arith.constant 0 : index
    %146 = vector.load %arg10[%c2_117, %c0_118, %c0_119] : memref<3x9x1xf32, #tpu.memory_space<vmem>>, vector<1x9x1xf32>
    %147 = vector.shape_cast %146 : vector<1x9x1xf32> to vector<9x1xf32>
    %148 = vector.broadcast %147 : vector<9x1xf32> to vector<9x256xf32>
    %149 = arith.addf %145, %148 : vector<9x256xf32>
    %c2_120 = arith.constant 2 : index
    %c0_121 = arith.constant 0 : index
    %c0_122 = arith.constant 0 : index
    %150 = vector.load %arg11[%c2_120, %c0_121, %c0_122] : memref<3x9x72xf32, #tpu.memory_space<vmem>>, vector<1x9x72xf32>
    %151 = vector.shape_cast %150 : vector<1x9x72xf32> to vector<9x72xf32>
    %cst_123 = arith.constant dense<0.000000e+00> : vector<9x256xf32>
    %152 = tpu.matmul %151, %131, %cst_123 {dimension_numbers = #tpu.dot_dimension_numbers<[1], [0], [0], [1], [0, 0, 1, 1], [], []>} : vector<9x72xf32>, vector<72x256xf32>, vector<9x256xf32> -> vector<9x256xf32>
    %c2_124 = arith.constant 2 : index
    %c0_125 = arith.constant 0 : index
    %c0_126 = arith.constant 0 : index
    %153 = vector.load %arg12[%c2_124, %c0_125, %c0_126] : memref<3x9x1xf32, #tpu.memory_space<vmem>>, vector<1x9x1xf32>
    %154 = vector.shape_cast %153 : vector<1x9x1xf32> to vector<9x1xf32>
    %155 = vector.broadcast %154 : vector<9x1xf32> to vector<9x256xf32>
    %156 = arith.addf %152, %155 : vector<9x256xf32>
    %157 = vector.shape_cast %142 : vector<9x256xf32> to vector<9x1x256xf32>
    %158 = vector.broadcast %157 : vector<9x1x256xf32> to vector<9x8x256xf32>
    %159 = arith.mulf %158, %127 : vector<9x8x256xf32>
    %cst_127 = arith.constant dense<0.000000e+00> : vector<8x256xf32>
    %160 = vector.multi_reduction <add>, %159, %cst_127 [0] : vector<9x8x256xf32> to vector<8x256xf32>
    %161 = vector.shape_cast %149 : vector<9x256xf32> to vector<9x1x256xf32>
    %162 = vector.broadcast %161 : vector<9x1x256xf32> to vector<9x8x256xf32>
    %163 = arith.mulf %162, %127 : vector<9x8x256xf32>
    %cst_128 = arith.constant dense<0.000000e+00> : vector<8x256xf32>
    %164 = vector.multi_reduction <add>, %163, %cst_128 [0] : vector<9x8x256xf32> to vector<8x256xf32>
    %165 = vector.shape_cast %156 : vector<9x256xf32> to vector<9x1x256xf32>
    %166 = vector.broadcast %165 : vector<9x1x256xf32> to vector<9x8x256xf32>
    %167 = arith.mulf %166, %129 : vector<9x8x256xf32>
    %cst_129 = arith.constant dense<0.000000e+00> : vector<8x256xf32>
    %168 = vector.multi_reduction <add>, %167, %cst_129 [0] : vector<9x8x256xf32> to vector<8x256xf32>
    %169 = arith.mulf %1, %160 : vector<8x256xf32>
    %170 = arith.addf %169, %164 : vector<8x256xf32>
    %171 = arith.addf %170, %168 : vector<8x256xf32>
    %c0_130 = arith.constant 0 : index
    %c2_131 = arith.constant 2 : index
    %c0_132 = arith.constant 0 : index
    %c0_133 = arith.constant 0 : index
    %172 = vector.load %arg5[%c0_130, %c2_131, %c0_132, %c0_133] : memref<1x3x8x8xf32, #tpu.memory_space<vmem>>, vector<1x1x8x8xf32>
    %173 = vector.shape_cast %172 : vector<1x1x8x8xf32> to vector<8x8xf32>
    %cst_134 = arith.constant dense<0.000000e+00> : vector<8x256xf32>
    %174 = tpu.matmul %173, %171, %cst_134 {dimension_numbers = #tpu.dot_dimension_numbers<[0], [0], [1], [1], [0, 1, 1, 1], [], []>} : vector<8x8xf32>, vector<8x256xf32>, vector<8x256xf32> -> vector<8x256xf32>
    %175 = arith.negf %174 : vector<8x256xf32>
    %176 = math.exp %175 : vector<8x256xf32>
    %cst_135 = arith.constant 1.000000e+00 : f32
    %177 = vector.broadcast %cst_135 : f32 to vector<8x256xf32>
    %178 = arith.addf %177, %176 : vector<8x256xf32>
    %179 = arith.divf %177, %178 : vector<8x256xf32>
    %cst_136 = arith.constant dense<0.000000e+00> : vector<8x256xf32>
    %180 = tpu.matmul %173, %179, %cst_136 {dimension_numbers = #tpu.dot_dimension_numbers<[1], [0], [0], [1], [0, 0, 1, 1], [], []>} : vector<8x8xf32>, vector<8x256xf32>, vector<8x256xf32> -> vector<8x256xf32>
    %181 = arith.mulf %171, %180 : vector<8x256xf32>
    %182 = arith.mulf %181, %160 : vector<8x256xf32>
    %c2_137 = arith.constant 2 : index
    %c0_138 = arith.constant 0 : index
    %c0_139 = arith.constant 0 : index
    %183 = vector.load %arg13[%c2_137, %c0_138, %c0_139] : memref<3x8x8xf32, #tpu.memory_space<vmem>>, vector<1x8x8xf32>
    %184 = vector.shape_cast %183 : vector<1x8x8xf32> to vector<8x8xf32>
    %cst_140 = arith.constant dense<0.000000e+00> : vector<8x256xf32>
    %185 = tpu.matmul %184, %182, %cst_140 {dimension_numbers = #tpu.dot_dimension_numbers<[1], [0], [0], [1], [0, 0, 1, 1], [], []>} : vector<8x8xf32>, vector<8x256xf32>, vector<8x256xf32> -> vector<8x256xf32>
    %186 = arith.addf %125, %185 : vector<8x256xf32>
    %c0_141 = arith.constant 0 : index
    %c0_142 = arith.constant 0 : index
    %187 = vector.load %arg14[%c0_141, %c0_142] : memref<8x1xf32, #tpu.memory_space<vmem>>, vector<8x1xf32>
    %188 = vector.broadcast %187 : vector<8x1xf32> to vector<8x256xf32>
    %189 = arith.addf %186, %188 : vector<8x256xf32>
    %cst_143 = arith.constant 0.000000e+00 : f32
    %190 = vector.broadcast %cst_143 : f32 to vector<8x256xf32>
    %191 = arith.maximumf %189, %190 : vector<8x256xf32>
    %c0_144 = arith.constant 0 : index
    %c0_145 = arith.constant 0 : index
    %c0_146 = arith.constant 0 : index
    %192 = vector.load %arg15[%c0_144, %c0_145, %c0_146] : memref<1x8x256xf32, #tpu.memory_space<vmem>>, vector<1x8x256xf32>
    %193 = vector.shape_cast %192 : vector<1x8x256xf32> to vector<8x256xf32>
    %194 = vector.shape_cast %191 : vector<8x256xf32> to vector<1x8x256xf32>
    tpu.vector_store %arg15[%c0_144, %c0_145, %c0_146], %194 {strides = array<i32>} : memref<1x8x256xf32, #tpu.memory_space<vmem>>, vector<1x8x256xf32>,
    return
  }
  func.func @transform_0(%arg0: i32, %arg1: i32) -> (i32, i32, i32, i32) {
    %c0_i32 = arith.constant 0 : i32
    %c0_i32_0 = arith.constant 0 : i32
    %c0_i32_1 = arith.constant 0 : i32
    return %arg0, %c0_i32, %c0_i32_0, %arg1 : i32, i32, i32, i32
  }
  func.func @transform_1(%arg0: i32, %arg1: i32) -> (i32, i32, i32, i32) {
    %c0_i32 = arith.constant 0 : i32
    %c0_i32_0 = arith.constant 0 : i32
    %c0_i32_1 = arith.constant 0 : i32
    return %arg0, %c0_i32, %c0_i32_0, %arg1 : i32, i32, i32, i32
  }
  func.func @transform_2(%arg0: i32, %arg1: i32) -> (i32, i32, i32) {
    %c0_i32 = arith.constant 0 : i32
    %c0_i32_0 = arith.constant 0 : i32
    return %arg0, %c0_i32, %arg1 : i32, i32, i32
  }
  func.func @transform_3(%arg0: i32, %arg1: i32) -> (i32, i32, i32, i32) {
    %c0_i32 = arith.constant 0 : i32
    %c0_i32_0 = arith.constant 0 : i32
    %c0_i32_1 = arith.constant 0 : i32
    %c0_i32_2 = arith.constant 0 : i32
    return %arg0, %c0_i32, %c0_i32_0, %c0_i32_1 : i32, i32, i32, i32
  }
  func.func @transform_4(%arg0: i32, %arg1: i32) -> (i32, i32, i32) {
    %c0_i32 = arith.constant 0 : i32
    %c0_i32_0 = arith.constant 0 : i32
    %c0_i32_1 = arith.constant 0 : i32
    %c0_i32_2 = arith.constant 0 : i32
    return %c0_i32, %c0_i32_0, %c0_i32_1 : i32, i32, i32
  }
  func.func @transform_5(%arg0: i32, %arg1: i32) -> (i32, i32, i32) {
    %c0_i32 = arith.constant 0 : i32
    %c0_i32_0 = arith.constant 0 : i32
    %c0_i32_1 = arith.constant 0 : i32
    %c0_i32_2 = arith.constant 0 : i32
    return %c0_i32, %c0_i32_0, %c0_i32_1 : i32, i32, i32
  }
  func.func @transform_6(%arg0: i32, %arg1: i32) -> (i32, i32, i32) {
    %c0_i32 = arith.constant 0 : i32
    %c0_i32_0 = arith.constant 0 : i32
    %c0_i32_1 = arith.constant 0 : i32
    %c0_i32_2 = arith.constant 0 : i32
    return %c0_i32, %c0_i32_0, %c0_i32_1 : i32, i32, i32
  }
  func.func @transform_7(%arg0: i32, %arg1: i32) -> (i32, i32, i32) {
    %c0_i32 = arith.constant 0 : i32
    %c0_i32_0 = arith.constant 0 : i32
    %c0_i32_1 = arith.constant 0 : i32
    %c0_i32_2 = arith.constant 0 : i32
    return %c0_i32, %c0_i32_0, %c0_i32_1 : i32, i32, i32
  }
  func.func @transform_8(%arg0: i32, %arg1: i32) -> (i32, i32, i32) {
    %c0_i32 = arith.constant 0 : i32
    %c0_i32_0 = arith.constant 0 : i32
    %c0_i32_1 = arith.constant 0 : i32
    %c0_i32_2 = arith.constant 0 : i32
    return %c0_i32, %c0_i32_0, %c0_i32_1 : i32, i32, i32
  }
  func.func @transform_9(%arg0: i32, %arg1: i32) -> (i32, i32, i32) {
    %c0_i32 = arith.constant 0 : i32
    %c0_i32_0 = arith.constant 0 : i32
    %c0_i32_1 = arith.constant 0 : i32
    %c0_i32_2 = arith.constant 0 : i32
    return %c0_i32, %c0_i32_0, %c0_i32_1 : i32, i32, i32
  }
  func.func @transform_10(%arg0: i32, %arg1: i32) -> (i32, i32, i32) {
    %c0_i32 = arith.constant 0 : i32
    %c0_i32_0 = arith.constant 0 : i32
    %c0_i32_1 = arith.constant 0 : i32
    %c0_i32_2 = arith.constant 0 : i32
    return %c0_i32, %c0_i32_0, %c0_i32_1 : i32, i32, i32
  }
  func.func @transform_11(%arg0: i32, %arg1: i32) -> (i32, i32, i32) {
    %c0_i32 = arith.constant 0 : i32
    %c0_i32_0 = arith.constant 0 : i32
    %c0_i32_1 = arith.constant 0 : i32
    %c0_i32_2 = arith.constant 0 : i32
    return %c0_i32, %c0_i32_0, %c0_i32_1 : i32, i32, i32
  }
  func.func @transform_12(%arg0: i32, %arg1: i32) -> (i32, i32) {
    %c0_i32 = arith.constant 0 : i32
    %c0_i32_0 = arith.constant 0 : i32
    %c0_i32_1 = arith.constant 0 : i32
    return %c0_i32, %c0_i32_0 : i32, i32
  }
  func.func @transform_13(%arg0: i32, %arg1: i32) -> (i32, i32, i32) {
    %c0_i32 = arith.constant 0 : i32
    %c0_i32_0 = arith.constant 0 : i32
    return %arg0, %c0_i32, %arg1 : i32, i32, i32
  }
  func.func @transform_14(%arg0: i32, %arg1: i32) -> (i32, i32, i32) {
    %c0_i32 = arith.constant 0 : i32
    %c0_i32_0 = arith.constant 0 : i32
    return %arg0, %c0_i32, %arg1 : i32, i32, i32
  }
}

</mosaic_0001>

<bundles_post_ra>
// kernel: attention_gated_msg_forward.1
= control target key start
LH: loop header
LB: loop body
LE: loop exit
PB: predicated region body
PF: predicated region fallthrough
CT: control target
= control target key end

     0   :  { %s4991_s29 = smov 0   ;;  %s4993_s30 = smov 0   ;;  %s6414_s0 = inlined_call_operand.vmem [shape: f32[2,27,8,256], index: 0, kind: input, shape index: {}]   ;;  %s6415_s1 = inlined_call_operand.vmem [shape: f32[2,27,8,256], index: 1, kind: input, shape index: {}]   ;;  %s6416_s2 = inlined_call_operand.vmem [shape: f32[2,8,256], index: 2, kind: input, shape index: {}]   ;;  %s6417_s3 = inlined_call_operand.vmem [shape: f32[2,3,8,8], index: 3, kind: input, shape index: {}]   ;;  %s6418_s4 = inlined_call_operand.vmem [shape: f32[3,9,72], index: 4, kind: input, shape index: {}]   ;;  %s6419_s5 = inlined_call_operand.vmem [shape: f32[3,9,72], index: 5, kind: input, shape index: {}]   ;;  %s6420_s6 = inlined_call_operand.vmem [shape: f32[3,9,1], index: 6, kind: input, shape index: {}]   ;;  %s6421_s7 = inlined_call_operand.vmem [shape: f32[3,9,72], index: 7, kind: input, shape index: {}]   ;;  %s6422_s8 = inlined_call_operand.vmem [shape: f32[3,9,1], index: 8, kind: input, shape index: {}]   ;;  %s6423_s9 = inlined_call_operand.vmem [shape: f32[3,9,72], index: 9, kind: input, shape index: {}]   ;;  %s6424_s10 = inlined_call_operand.vmem [shape: f32[3,9,1], index: 10, kind: input, shape index: {}]   ;;  %s6425_s11 = inlined_call_operand.vmem [shape: f32[3,8,8], index: 11, kind: input, shape index: {}]   ;;  %s6426_s12 = inlined_call_operand.vmem [shape: f32[8,1], index: 12, kind: input, shape index: {}]   ;;  %s6427_s13 = inlined_call_operand.vmem [shape: f32[2,8,256], index: 13, kind: output, shape index: {0}]   ;;  %s6428_s14 = inlined_call_operand.vmem [shape: f32[2,8,256], index: 14, kind: output, shape index: {1}]  }
   0x1   :  { %6465 = sst [smem:[#allocation18_spill]] %s6414_s0  ;;  %s4995_s15 = smov 0  }
   0x2 LB: > { %s37_s16 = sadd.s32 1, %s4907_s30  ;;  %p4673_p0 = scmp.ge.s32.totalorder %s4911_s15, 1  ;;  %s4911_s15 = sphi %s4995_s15, %s25_s15   ;;  %s4907_s30 = sphi %s4993_s30, %s6548_s30   ;;  %s4903_s29 = sphi %s4991_s29, %s6547_s29  }
   0x3   : > { %p39_p1 = scmp.ge.s32.totalorder %s37_s16, 2  ;;  %p482_p2 = scmp.lt.s32.totalorder %s4911_s15, 3 }
   0x5   : > { %s6550_s16 = smov (%p39_p1, %s37_s16), 0  ;;  %p483_p3 = pnand %p4673_p0, %p482_p2 }
   0x7   : > { %486 = sbr.rel (%p483_p3) target bundleno = 2131 (0x853), region = 72 }
   0xc   : > { %p569_p4 = scmp.lt.s32.totalorder %s4903_s29, 1  ;;  %v947_v0 = vld [vmem:[%s6424_s10] sm:$0xff]  ;;  %v4913_v2 = vmov 0   ;;  %v833_v3 = vld [vmem:[%s6420_s6 + $0x8] sm:$0x1]  ;;  %v6429_v5 = vmov 0.0  }
   0xd   : > { %v832_v1 = vld [vmem:[%s6420_s6] sm:$0xff]  ;;  %4861 = vset.pattern.permute.xlu1 %v4913_v2  ;;  %4860 = vset.pattern.permute.xlu0 %v4913_v2  ;;  %s6466_s0 = sld [smem:[#allocation18_spill]]  ;;  %v948_v26 = vld [vmem:[%s6424_s10 + $0x8] sm:$0x1]  ;;  %v4739_v35 = vld [vmem:[%s6420_s6 + $0x10] sm:$0xff]  ;;  %vm665_vm0 = vcmask 588800  }
   0xe   : > { %s6552_s29 = smov (!%p569_p4, %s4903_s29), 1  ;;  %951 = vperm.xlu1 %4861, %v947_v0   ;;  %836 = vperm.xlu0 %4860, %v832_v1   ;;  %v850_v4 = vld [vmem:[%s6422_s8] sm:$0xff]  ;;  %v851_v40 = vld [vmem:[%s6422_s8 + $0x8] sm:$0x1]  ;;  %v4743_v45 = vld [vmem:[%s6422_s8 + $0x10] sm:$0xff]  ;;  %vm1660_vm1 = vcmask 64512  }
   0xf   : > { %736 = vmatprep.mubr.f32.mxu0 %v6429_v5  ;;  %819 = vmatprep.mubr.f32.mxu1 %v6429_v5  ;;  %s4831_s25 = smul.u32 432, %s6552_s29  ;;  %v663_v46 = vld [vmem:[%s6419_s5] sm:$0xff]  ;;  %v4749_v48 = vld [vmem:[%s6424_s10 + $0x10] sm:$0xff]  ;;  %v4740_v49 = vld [vmem:[%s6420_s6 + $0x18] sm:$0x1] }
  0x10   : > { %v661_v47 = vld [vmem:[%s6418_s4] sm:$0xff]  ;;  %v4744_v50 = vld [vmem:[%s6422_s8 + $0x18] sm:$0x1]  ;;  %v664_v51 = vld [vmem:[%s6419_s5 + $0x8] sm:$0x1]  ;;  %s4832_s24 = smul.u32 24, %s6552_s29 }
  0x11   : > { %s5029_s28 = scalar_lea.vmem %s6415_s1, %s4831_s25  ;;  %v662_v52 = vld [vmem:[%s6418_s4 + $0x8] sm:$0x1]  ;;  %v4750_v53 = vld [vmem:[%s6424_s10 + $0x18] sm:$0x1]  ;;  %v848_v54 = vld [vmem:[%s6421_s7] sm:$0xff] }
  0x12   : > { %841 = vperm.xlu1 %4861, %v833_v3   ;;  %854 = vperm.xlu0 %4860, %v850_v4   ;;  %v5037_v6 = vld [vmem:[%s5029_s28 + $0x88] sm:$0xff]  ;;  %v5043_v8 = vld [vmem:[%s5029_s28 + $0x80] sm:$0xff]  ;;  %v5051_v10 = vld [vmem:[%s5029_s28 + $0x78] sm:$0xff]  ;;  %s5266_s21 = scalar_lea.vmem %s6417_s3, %s4832_s24  ;;  %v4915_v3 = vmov 1966171168  }
  0x13   : > { %s5034_s19 = scalar_lea.vmem %s6466_s0, %s4831_s25  ;;  %6467 = vst [vmem:[#allocation2_spill] sm:$0xff] %v5037_v6  ;;  %6469 = vst [vmem:[#allocation4_spill] sm:$0xff] %v5043_v8  ;;  %686 = vmatprep.subr.mxu0 %v5037_v6  ;;  %v5059_v12 = vld [vmem:[%s5029_s28 + $0x70] sm:$0xff]  ;;  %v5065_v14 = vld [vmem:[%s5029_s28 + $0x68] sm:$0xff]  ;;  %v1049_v4 = vunpack.c.l.s4 %v4915_v3  ;;  %s5486_s0 = sshll.u32 %s6552_s29, 4 }
  0x14   : > { %v5040_v7 = vld [vmem:[%s5034_s19 + $0x88] sm:$0xff]  ;;  %v5048_v9 = vld [vmem:[%s5034_s19 + $0x80] sm:$0xff]  ;;  %6471 = vst [vmem:[#allocation6_spill] sm:$0xff] %v5051_v10  ;;  %v5054_v11 = vld [vmem:[%s5034_s19 + $0x78] sm:$0xff]  ;;  %687 = vmatpush1.msra.mxu0 %v5043_v8  ;;  %s5503_s22 = scalar_lea.vmem %s6416_s2, %s5486_s0  ;;  %s621_s23 = scalar_lea.vmem %s6428_s14, %s5486_s0 }
  0x15   : > { %6468 = vst [vmem:[#allocation3_spill] sm:$0xff] %v5040_v7  ;;  %769 = vmatprep.subr.mxu1 %v5040_v7  ;;  %6470 = vst [vmem:[#allocation5_spill] sm:$0xff] %v5048_v9  ;;  %v5062_v13 = vld [vmem:[%s5034_s19 + $0x70] sm:$0xff]  ;;  %688 = vmatprep.subr.mxu0 %v5051_v10  ;;  %v5070_v15 = vld [vmem:[%s5034_s19 + $0x68] sm:$0xff]  ;;  %s611_s24 = scalar_lea.vmem %s6427_s13, %s5486_s0 }
  0x16   : > { %770 = vmatpush1.msra.mxu1 %v5048_v9  ;;  %6472 = vst [vmem:[#allocation7_spill] sm:$0xff] %v5059_v12  ;;  %6473 = vst [vmem:[#allocation8_spill] sm:$0xff] %v5062_v13  ;;  %v5073_v16 = vld [vmem:[%s5029_s28 + $0x60] sm:$0xff]  ;;  %689 = vmatpush1.msra.mxu0 %v5059_v12  ;;  %v5081_v18 = vld [vmem:[%s5029_s28 + $0x58] sm:$0xff] }
  0x17   : > { %6474 = vst [vmem:[#allocation9_spill] sm:$0xff] %v5065_v14  ;;  %771 = vmatprep.subr.mxu1 %v5054_v11  ;;  %6475 = vst [vmem:[#allocation10_spill] sm:$0xff] %v5073_v16  ;;  %v5076_v17 = vld [vmem:[%s5034_s19 + $0x60] sm:$0xff]  ;;  %v5084_v19 = vld [vmem:[%s5034_s19 + $0x58] sm:$0xff]  ;;  %690 = vmatprep.subr.mxu0 %v5065_v14 }
  0x18   : > { %772 = vmatpush1.msra.mxu1 %v5062_v13  ;;  %6476 = vst [vmem:[#allocation11_spill] sm:$0xff] %v5081_v18  ;;  %v5089_v20 = vld [vmem:[%s5029_s28 + $0x50] sm:$0xff]  ;;  %691 = vmatpush1.msra.mxu0 %v5073_v16  ;;  %v5097_v22 = vld [vmem:[%s5029_s28 + $0x48] sm:$0xff]  ;;  %v5105_v24 = vld [vmem:[%s5029_s28 + $0x40] sm:$0xff] }
  0x19   : > { %773 = vmatprep.subr.mxu1 %v5070_v15  ;;  %v5092_v21 = vld [vmem:[%s5034_s19 + $0x50] sm:$0xff]  ;;  %v5100_v23 = vld [vmem:[%s5034_s19 + $0x48] sm:$0xff]  ;;  %692 = vmatprep.subr.mxu0 %v5081_v18  ;;  %v5108_v25 = vld [vmem:[%s5034_s19 + $0x40] sm:$0xff] }
  0x1a   : > { %774 = vmatpush1.msra.mxu1 %v5076_v17  ;;  %693 = vmatpush1.msra.mxu0 %v5089_v20  ;;  %v5116_v27 = vld [vmem:[%s5029_s28 + $0x38] sm:$0xff]  ;;  %v5124_v29 = vld [vmem:[%s5029_s28 + $0x30] sm:$0xff]  ;;  %v5132_v31 = vld [vmem:[%s5029_s28 + $0x28] sm:$0xff] }
  0x1b   : > { %775 = vmatprep.subr.mxu1 %v5084_v19  ;;  %694 = vmatprep.subr.mxu0 %v5097_v22  ;;  %v5121_v28 = vld [vmem:[%s5034_s19 + $0x38] sm:$0xff]  ;;  %v5129_v30 = vld [vmem:[%s5034_s19 + $0x30] sm:$0xff]  ;;  %v5136_v32 = vld [vmem:[%s5034_s19 + $0x28] sm:$0xff] }
  0x1c   : > { %776 = vmatpush1.msra.mxu1 %v5092_v21  ;;  %695 = vmatpush1.msra.mxu0 %v5105_v24  ;;  %v5139_v33 = vld [vmem:[%s5029_s28 + $0x20] sm:$0xff]  ;;  %v5152_v36 = vld [vmem:[%s5029_s28 + $0x18] sm:$0xff]  ;;  %v5160_v38 = vld [vmem:[%s5029_s28 + $0x10] sm:$0xff] }
  0x1d   : > { %777 = vmatprep.subr.mxu1 %v5100_v23  ;;  %956 = vperm.xlu1 %4861, %v948_v26   ;;  %v5144_v34 = vld [vmem:[%s5034_s19 + $0x20] sm:$0xff]  ;;  %v5155_v37 = vld [vmem:[%s5034_s19 + $0x18] sm:$0xff]  ;;  %v5163_v39 = vld [vmem:[%s5034_s19 + $0x10] sm:$0xff]  ;;  %v1051_v26 = vlaneseq }
  0x1e   : > { %778 = vmatpush1.msra.mxu1 %v5108_v25  ;;  %696 = vmatprep.subr.mxu0 %v5116_v27  ;;  %v5170_v41 = vld [vmem:[%s5029_s28 + $0x8] sm:$0xff]  ;;  %v5178_v43 = vld [vmem:[%s5029_s28] sm:$0xff] }
  0x1f   : > { %779 = vmatprep.subr.mxu1 %v5121_v28  ;;  %697 = vmatpush1.msra.mxu0 %v5124_v29  ;;  %v5175_v42 = vld [vmem:[%s5034_s19 + $0x8] sm:$0xff]  ;;  %v5183_v44 = vld [vmem:[%s5034_s19] sm:$0xff] }
  0x20   : > { %780 = vmatpush1.msra.mxu1 %v5129_v30  ;;  %698 = vmatprep.subr.mxu0 %v5132_v31  ;;  %v945_v55 = vld [vmem:[%s6423_s9] sm:$0xff]  ;;  %v849_v57 = vld [vmem:[%s6421_s7 + $0x8] sm:$0x1] }
  0x21   : > { %781 = vmatprep.subr.mxu1 %v5136_v32  ;;  %699 = vmatpush1.msra.mxu0 %v5139_v33  ;;  %v5275_v56 = vld [vmem:[%s5266_s21] sm:$0xff]  ;;  %v946_v58 = vld [vmem:[%s6423_s9 + $0x8] sm:$0x1] }
  0x22   : > { %782 = vmatpush1.msra.mxu1 %v5144_v34  ;;  %2043 = vperm.xlu1 %4861, %v4739_v35   ;;  %6477 = vst [vmem:[#allocation12_spill] sm:$0xff] %v5275_v56  ;;  %v4753_v59 = vld [vmem:[%s5266_s21 + $0x8] sm:$0xff]  ;;  %v4805_v60 = vld [vmem:[%s6420_s6 + $0x20] sm:$0xff] }
  0x23   : > { %700 = vmatprep.subr.mxu0 %v5152_v36  ;;  %783 = vmatprep.subr.mxu1 %v5155_v37  ;;  %v4815_v61 = vld [vmem:[%s6424_s10 + $0x20] sm:$0xff]  ;;  %v4806_v62 = vld [vmem:[%s6420_s6 + $0x28] sm:$0x1] }
  0x24   : > { %701 = vmatpush1.msra.mxu0 %v5160_v38  ;;  %784 = vmatpush1.msra.mxu1 %v5163_v39  ;;  %v4810_v63 = vld [vmem:[%s6422_s8 + $0x28] sm:$0x1]  ;;  %v4809_v1 = vld [vmem:[%s6422_s8 + $0x20] sm:$0xff] }
  0x25   : > { %859 = vperm.xlu0 %4860, %v851_v40   ;;  %702 = vmatprep.subr.mxu0 %v5170_v41  ;;  %v4816_v0 = vld [vmem:[%s6424_s10 + $0x28] sm:$0x1]  ;;  %v4472_v2 = vld [vmem:[%s6426_s12] sm:$0xff] }
  0x26   : > { %785 = vmatprep.subr.mxu1 %v5175_v42  ;;  %703 = vmatpush1.msra.mxu0 %v5178_v43 }
  0x27   : > { %786 = vmatpush1.msra.mxu1 %v5183_v44  ;;  %2063 = vperm.xlu1 %4861, %v4743_v45  }
  0x28   : > { %4683 = vmatmul.mubr.msk.f32.vlgmr.msra.gmra.mxu0 %vm665_vm0, %v663_v46  ;;  %4685 = vmatmul.mubr.msk.f32.vlgmr.msra.gmra.mxu1 %vm665_vm0, %v661_v47  ;;  %v1050_v47 = vunpack.c.0.s8 %v1049_v4 }
  0x29   : > { %882 = vmatprep.subr.mxu0 %v5040_v7  ;;  %979 = vmatprep.subr.mxu1 %v5037_v6 }
  0x2a   : > { %883 = vmatpush1.msra.mxu0 %v5048_v9  ;;  %980 = vmatpush1.msra.mxu1 %v5043_v8 }
  0x2b   : > { %884 = vmatprep.subr.mxu0 %v5054_v11  ;;  %981 = vmatprep.subr.mxu1 %v5051_v10 }
  0x2c   : > { %885 = vmatpush1.msra.mxu0 %v5062_v13  ;;  %982 = vmatpush1.msra.mxu1 %v5059_v12 }
  0x2d   : > { %2162 = vperm.xlu1 %4861, %v4749_v48   ;;  %886 = vmatprep.subr.mxu0 %v5070_v15  ;;  %v1052_v48 = vshrl.u32 %v1051_v26, 7 }
  0x2e   : > { %983 = vmatprep.subr.mxu1 %v5065_v14  ;;  %887 = vmatpush1.msra.mxu0 %v5076_v17 }
  0x2f   : > { %984 = vmatpush1.msra.mxu1 %v5073_v16  ;;  %888 = vmatprep.subr.mxu0 %v5084_v19 }
  0x30   : > { %985 = vmatprep.subr.mxu1 %v5081_v18  ;;  %889 = vmatpush1.msra.mxu0 %v5092_v21 }
  0x31   : > { %986 = vmatpush1.msra.mxu1 %v5089_v20  ;;  %2048 = vperm.xlu1 %4861, %v4740_v49  }
  0x32   : > { %890 = vmatprep.subr.mxu0 %v5100_v23  ;;  %987 = vmatprep.subr.mxu1 %v5097_v22 }
  0x33   : > { %891 = vmatpush1.msra.mxu0 %v5108_v25  ;;  %988 = vmatpush1.msra.mxu1 %v5105_v24 }
  0x34   : > { %892 = vmatprep.subr.mxu0 %v5121_v28  ;;  %989 = vmatprep.subr.mxu1 %v5116_v27 }
  0x35   : > { %742 = vmatprep.mubr.f32.mxu0 %v6429_v5  ;;  %825 = vmatprep.mubr.f32.mxu1 %v6429_v5 }
  0x36   : > { %893 = vmatpush1.msra.mxu0 %v5129_v30  ;;  %990 = vmatpush1.msra.mxu1 %v5124_v29 }
  0x37   : > { %2068 = vperm.xlu1 %4861, %v4744_v50   ;;  %4684 = vmatmul.mubr.msk.f32.gmra.mxu0 %vm665_vm0, %v664_v51 }
  0x38   : > { %4686 = vmatmul.mubr.msk.f32.gmra.mxu1 %vm665_vm0, %v662_v52  ;;  %894 = vmatprep.subr.mxu0 %v5136_v32 }
  0x39   : > { %991 = vmatprep.subr.mxu1 %v5132_v31  ;;  %895 = vmatpush1.msra.mxu0 %v5144_v34 }
  0x3a   : > { %992 = vmatpush1.msra.mxu1 %v5139_v33  ;;  %896 = vmatprep.subr.mxu0 %v5155_v37 }
  0x3b   : > { %993 = vmatprep.subr.mxu1 %v5152_v36  ;;  %897 = vmatpush1.msra.mxu0 %v5163_v39 }
  0x3c   : > { %994 = vmatpush1.msra.mxu1 %v5160_v38  ;;  %2167 = vperm.xlu1 %4861, %v4750_v53  }
  0x3d   : > { %898 = vmatprep.subr.mxu0 %v5175_v42  ;;  %995 = vmatprep.subr.mxu1 %v5170_v41 }
  0x3e   : > { %899 = vmatpush1.msra.mxu0 %v5183_v44  ;;  %932 = vmatprep.mubr.f32.mxu0 %v6429_v5 }
  0x3f   : > { %996 = vmatpush1.msra.mxu1 %v5178_v43  ;;  %1029 = vmatprep.mubr.f32.mxu1 %v6429_v5 }
  0x40   : > { %4687 = vmatmul.mubr.msk.f32.vlgmr.msra.gmra.mxu0 %vm665_vm0, %v848_v54  ;;  %4689 = vmatmul.mubr.msk.f32.vlgmr.msra.gmra.mxu1 %vm665_vm0, %v945_v55  ;;  %v5312_v54 = vsub.s32 %v1050_v47, %v1052_v48 }
  0x41   : > { %938 = vmatprep.mubr.f32.mxu0 %v6429_v5  ;;  %1035 = vmatprep.mubr.f32.mxu1 %v6429_v5 }
  0x43   : > { %1628 = vxpose.xlu0.b32.start.end [1/1] (short) (narrow) %v5275_v56, 8 }
  0x44   : > { %4688 = vmatmul.mubr.msk.f32.gmra.mxu0 %vm665_vm0, %v849_v57  ;;  %4690 = vmatmul.mubr.msk.f32.gmra.mxu1 %vm665_vm0, %v946_v58 }
  0x45   : > { %1728 = vmatprep.mubr.f32.mxu0 %v6429_v5  ;;  %1814 = vmatprep.mubr.f32.mxu1 %v6429_v5 }
  0x65   : > { %2840 = vxpose.xlu1.b32.start.end [1/1] (short) (narrow) %v4753_v59, 8 }
  0x6c   : > { %3401 = vperm.xlu0 %4860, %v4805_v60   ;;  %v5316_v60 = vsub.s32 0, %v1052_v48 }
  0x70   : > { %3520 = vperm.xlu0 %4860, %v4815_v61  }
  0x74   : > { %3406 = vperm.xlu0 %4860, %v4806_v62  }
  0x78   : > { %3426 = vperm.xlu0 %4860, %v4810_v63   ;;  %v5319_v63 = vsub.s32 1, %v1052_v48 }
  0x7c   : > { %3525 = vperm.xlu0 %4860, %v4816_v0  }
  0x83   : > { %3421 = vperm.xlu1 %4861, %v4809_v1  }
  0x87   : > { %4475 = vperm.xlu1 %4861, %v4472_v2  }
  0x89   : > { %v837_v45 = vpop.permute.xlu0 %836 }
  0xe8   : > { %v738_v35 = vpop.f32.mrf.mxu0  ;;  %v821_v40 = vpop.f32.mrf.mxu1 }
  0xe9   : > { %v822_v46 = vadd.f32 %v821_v40, %v738_v35 }
  0xea   : > { %v740_v49 = vpop.f32.mrf.mxu0  ;;  %v823_v50 = vpop.f32.mrf.mxu1 }
  0xeb   : > { %v844_v51 = vadd.f32 %v837_v45, %v822_v46  ;;  %v824_v52 = vadd.f32 %v823_v50, %v740_v49  ;;  %v952_v49 = vpop.permute.xlu1 %951 }
  0xed   : > { %v845_v53 = vadd.f32 %v837_v45, %v824_v52 }
  0xef   : > { %v1046_v55 = vcombine.low %v844_v51, %v845_v53  ;;  %v1047_v57 = vcombine.high %v844_v51, %v845_v53 }
  0xf1   : > { %v1054_v58 = vrot.slane %v1046_v55, %v5312_v54  ;;  %v1061_v59 = vrot.slane %v1047_v57, %v5312_v54 }
  0xf3   : > { %v1062_v61 = vcombine.high %v1054_v58, %v1054_v58  ;;  %v1070_v62 = vrot.slane %v1054_v58, %v5312_v54  ;;  %v1063_v2 = vcombine.high %v1061_v59, %v1061_v59  ;;  %v1077_v46 = vrot.slane %v1061_v59, %v5312_v54 }
  0xf5   : > { %v1084_v0 = vrot.slane %v1062_v61, %v5312_v54  ;;  %v1092_v1 = vcombine.high %v1070_v62, %v1070_v62  ;;  %v1114_v3 = vrot.slane %v1070_v62, %v5316_v60  ;;  %v1118_v26 = vrot.slane %v1070_v62, %v5319_v63 }
  0xf6   : > { %v1091_v50 = vrot.slane %v1063_v2, %v5312_v54  ;;  %v1093_v62 = vcombine.high %v1077_v46, %v1077_v46 }
  0xf7   : > { %v1094_v4 = vcombine.high %v1084_v0, %v1084_v0  ;;  %v1122_v35 = vrot.slane %v1084_v0, %v5316_v60  ;;  %v1126_v40 = vrot.slane %v1084_v0, %v5319_v63  ;;  %v744_v45 = vpop.f32.mrf.mxu0  ;;  %v1130_v48 = vrot.slane %v1092_v1, %v5316_v60 }
  0xf8   : > { %v827_v47 = vpop.f32.mrf.mxu1  ;;  %v1134_v51 = vrot.slane %v1092_v1, %v5319_v63  ;;  %v1201_v55 = vmul.f32 %v1114_v3, %v5183_v44  ;;  %v1202_v57 = vmul.f32 %v1118_v26, %v5175_v42  ;;  %v1146_v0 = vrot.slane %v1077_v46, %v5316_v60  ;;  %v842_v3 = vpop.permute.xlu1 %841 }
  0xf9   : > { %v1203_v52 = vmul.f32 %v1122_v35, %v5163_v39  ;;  %v1138_v53 = vrot.slane %v1094_v4, %v5316_v60  ;;  %v1204_v58 = vmul.f32 %v1126_v40, %v5155_v37  ;;  %v746_v61 = vpop.f32.mrf.mxu0  ;;  %v1205_v5 = vmul.f32 %v1130_v48, %v5144_v34 }
  0xfa   : > { %v829_v59 = vpop.f32.mrf.mxu1  ;;  %v1142_v1 = vrot.slane %v1094_v4, %v5319_v63  ;;  %v1206_v35 = vmul.f32 %v1134_v51, %v5136_v32  ;;  %v828_v6 = vadd.f32 %v827_v47, %v744_v45  ;;  %v1095_v12 = vcombine.high %v1091_v50, %v1091_v50 }
  0xfb   : > { %v1219_v2 = vadd.f32 %v1203_v52, %v1201_v55  ;;  %v1227_v56 = vadd.f32 %v1204_v58, %v1202_v57  ;;  %v830_v8 = vadd.f32 %v829_v59, %v746_v61  ;;  %v1150_v26 = vrot.slane %v1077_v46, %v5319_v63  ;;  %v855_v57 = vpop.permute.xlu0 %854 }
  0xfc   : > { %v1207_v40 = vmul.f32 %v1138_v53, %v5129_v30  ;;  %v1154_v14 = vrot.slane %v1091_v50, %v5316_v60  ;;  %v846_v7 = vadd.f32 %v842_v3, %v828_v6  ;;  %v1158_v4 = vrot.slane %v1091_v50, %v5319_v63 }
  0xfd   : > { %v1220_v10 = vadd.f32 %v1219_v2, %v1205_v5  ;;  %v1228_v18 = vadd.f32 %v1227_v56, %v1206_v35  ;;  %v847_v48 = vadd.f32 %v842_v3, %v830_v8  ;;  %v1162_v45 = vrot.slane %v1093_v62, %v5316_v60 }
  0xfe   : > { %v1166_v47 = vrot.slane %v1093_v62, %v5319_v63  ;;  %v1208_v46 = vmul.f32 %v1142_v1, %v5121_v28  ;;  %v1209_v53 = vmul.f32 %v1146_v0, %v5108_v25  ;;  %v1170_v6 = vrot.slane %v1095_v12, %v5316_v60 }
  0xff   : > { %v1221_v51 = vadd.f32 %v1220_v10, %v1207_v40  ;;  %v1096_v5 = vcombine.low %v846_v7, %v847_v48  ;;  %v1174_v10 = vrot.slane %v1095_v12, %v5319_v63  ;;  %v1210_v62 = vmul.f32 %v1150_v26, %v5100_v23 }
 0x100   : > { %v934_v52 = vpop.f32.mrf.mxu0  ;;  %v1031_v55 = vpop.f32.mrf.mxu1  ;;  %v1229_v50 = vadd.f32 %v1228_v18, %v1208_v46  ;;  %v1211_v0 = vmul.f32 %v1154_v14, %v5092_v21  ;;  %v5353_v48 = vmul.f32 %v1158_v4, %v5084_v19  ;;  %v5364_v14 = vmul.f32 %v1166_v47, %v5070_v15 }
 0x101   : > { %v1032_v58 = vadd.f32 %v1031_v55, %v952_v49  ;;  %v935_v8 = vadd.f32 %v934_v52, %v855_v57  ;;  %v1222_v35 = vadd.f32 %v1221_v51, %v1209_v53  ;;  %v1103_v3 = vrot.slane %v1096_v5, %v5312_v54 }
 0x102   : > { %v936_v61 = vpop.f32.mrf.mxu0  ;;  %v1033_v56 = vpop.f32.mrf.mxu1  ;;  %v5359_v55 = vmul.f32 %v1162_v45, %v5076_v17  ;;  %v5368_v4 = vadd.f32 %v1229_v50, %v1210_v62  ;;  %v5371_v53 = vmul.f32 %v1174_v10, %v5054_v11  ;;  %v5374_v5 = vmul.f32 %v1170_v6, %v5062_v13 }
 0x103   : > { %v937_v59 = vadd.f32 %v936_v61, %v855_v57  ;;  %v1034_v2 = vadd.f32 %v1033_v56, %v952_v49  ;;  %v5356_v52 = vrot.slane %v1103_v3, %v5312_v54  ;;  %v860_v57 = vpop.permute.xlu0 %859  ;;  %v5366_v51 = vadd.f32 %v1222_v35, %v1211_v0 }
 0x104   : > { %v940_v16 = vpop.f32.mrf.mxu0  ;;  %v1037_v40 = vpop.f32.mrf.mxu1  ;;  %6479 = vst [vmem:[#allocation14_spill] sm:$0xff] %v5359_v55  ;;  %6481 = vst [vmem:[#allocation16_spill] sm:$0xff] %v5374_v5 }
 0x105   : > { %v1239_v7 = vcombine.low %v935_v8, %v937_v59  ;;  %v1240_v1 = vcombine.high %v935_v8, %v937_v59  ;;  %6478 = vst [vmem:[#allocation13_spill] sm:$0xff] %v5356_v52  ;;  %v1432_v49 = vcombine.low %v1032_v58, %v1034_v2  ;;  %v1433_v18 = vcombine.high %v1032_v58, %v1034_v2  ;;  %v957_v8 = vpop.permute.xlu1 %956 }
 0x106   : > { %6480 = vst [vmem:[#allocation15_spill] sm:$0xff] %v5366_v51  ;;  %v942_v46 = vpop.f32.mrf.mxu0  ;;  %v5377_v56 = vadd.f32 %v940_v16, %v860_v57  ;;  %v1039_v47 = vpop.f32.mrf.mxu1  ;;  %v1178_v59 = vrot.slane %v5356_v52, %v5316_v60  ;;  %v5385_v10 = vadd.f32 %v1037_v40, %v957_v8 }
 0x107   : > { %v1247_v12 = vrot.slane %v1239_v7, %v5312_v54  ;;  %v1254_v26 = vrot.slane %v1240_v1, %v5312_v54  ;;  %v1440_v35 = vrot.slane %v1432_v49, %v5312_v54  ;;  %v1447_v50 = vrot.slane %v1433_v18, %v5312_v54 }
 0x108   : > { %v5387_v62 = vadd.f32 %v942_v46, %v860_v57  ;;  %v5393_v1 = vadd.f32 %v1039_v47, %v957_v8  ;;  %v5399_v40 = vmul.f32 %v1178_v59, %v5048_v9 }
 0x109   : > { %v1255_v45 = vcombine.high %v1247_v12, %v1247_v12  ;;  %v1256_v58 = vcombine.high %v1254_v26, %v1254_v26  ;;  %v1263_v61 = vrot.slane %v1247_v12, %v5312_v54  ;;  %v1270_v2 = vrot.slane %v1254_v26, %v5312_v54 }
 0x10a   : > { %6482 = vst [vmem:[#allocation17_spill] sm:$0xff] %v5399_v40  ;;  %v1448_v46 = vcombine.high %v1440_v35, %v1440_v35  ;;  %v1456_v8 = vrot.slane %v1440_v35, %v5312_v54 }
 0x10b   : > { %v1277_v6 = vrot.slane %v1255_v45, %v5312_v54  ;;  %v1285_v3 = vcombine.high %v1263_v61, %v1263_v61  ;;  %v1284_v0 = vrot.slane %v1256_v58, %v5312_v54  ;;  %v1307_v7 = vrot.slane %v1263_v61, %v5316_v60 }
 0x10c   : > { %v1311_v49 = vrot.slane %v1263_v61, %v5319_v63  ;;  %v5401_v57 = vcombine.high %v1270_v2, %v1270_v2  ;;  %v1449_v45 = vcombine.high %v1447_v50, %v1447_v50  ;;  %v1339_v47 = vrot.slane %v1270_v2, %v5316_v60 }
 0x10d   : > { %v1287_v12 = vcombine.high %v1277_v6, %v1277_v6  ;;  %v1315_v18 = vrot.slane %v1277_v6, %v5316_v60  ;;  %v1319_v26 = vrot.slane %v1277_v6, %v5319_v63  ;;  %v1323_v58 = vrot.slane %v1285_v3, %v5316_v60 }
 0x10e   : > { %v1327_v16 = vrot.slane %v1285_v3, %v5319_v63  ;;  %v1343_v6 = vrot.slane %v1270_v2, %v5319_v63  ;;  %v5411_v40 = vcombine.high %v1284_v0, %v1284_v0  ;;  %v1394_v9 = vmul.f32 %v1307_v7, %v5183_v44 }
 0x10f   : > { %v1331_v61 = vrot.slane %v1287_v12, %v5316_v60  ;;  %v1335_v13 = vrot.slane %v1287_v12, %v5319_v63  ;;  %v1396_v59 = vmul.f32 %v1315_v18, %v5163_v39  ;;  %v1395_v5 = vmul.f32 %v1311_v49, %v5175_v42 }
 0x110   : > { %v1397_v3 = vmul.f32 %v1319_v26, %v5155_v37  ;;  %v1347_v51 = vrot.slane %v1284_v0, %v5316_v60  ;;  %v1351_v35 = vrot.slane %v1284_v0, %v5319_v63  ;;  %v1355_v55 = vrot.slane %v5401_v57, %v5316_v60 }
 0x111   : > { %v1359_v2 = vrot.slane %v5401_v57, %v5319_v63  ;;  %v1398_v39 = vmul.f32 %v1323_v58, %v5144_v34  ;;  %v1399_v12 = vmul.f32 %v1327_v16, %v5136_v32  ;;  %v1412_v18 = vadd.f32 %v1396_v59, %v1394_v9 }
 0x112   : > { %v1420_v44 = vadd.f32 %v1397_v3, %v1395_v5  ;;  %v1400_v42 = vmul.f32 %v1331_v61, %v5129_v30  ;;  %v1401_v37 = vmul.f32 %v1335_v13, %v5121_v28  ;;  %v1463_v7 = vrot.slane %v1447_v50, %v5312_v54 }
 0x113   : > { %v1470_v0 = vrot.slane %v1448_v46, %v5312_v54  ;;  %v1413_v49 = vadd.f32 %v1412_v18, %v1398_v39  ;;  %v5429_v52 = vrot.slane %v1449_v45, %v5312_v54  ;;  %v1478_v57 = vcombine.high %v1456_v8, %v1456_v8 }
 0x114   : > { %v1421_v26 = vadd.f32 %v1420_v44, %v1399_v12  ;;  %v1363_v34 = vrot.slane %v5411_v40, %v5316_v60  ;;  %v1402_v9 = vmul.f32 %v1339_v47, %v5108_v25  ;;  %v1403_v32 = vmul.f32 %v1343_v6, %v5100_v23 }
 0x115   : > { %v1480_v30 = vcombine.high %v1470_v0, %v1470_v0  ;;  %v1404_v13 = vmul.f32 %v1347_v51, %v5092_v21  ;;  %v1414_v28 = vadd.f32 %v1413_v49, %v1400_v42  ;;  %v1508_v50 = vrot.slane %v1470_v0, %v5316_v60 }
 0x116   : > { %v1422_v5 = vadd.f32 %v1421_v26, %v1401_v37  ;;  %v1405_v16 = vmul.f32 %v1351_v35, %v5084_v19  ;;  %v1500_v46 = vrot.slane %v1456_v8, %v5316_v60  ;;  %v1504_v45 = vrot.slane %v1456_v8, %v5319_v63 }
 0x117   : > { %v1512_v58 = vrot.slane %v1470_v0, %v5319_v63  ;;  %v5442_v61 = vmul.f32 %v1355_v55, %v5076_v17  ;;  %v1479_v25 = vcombine.high %v1463_v7, %v1463_v7  ;;  %v5446_v23 = vcombine.high %v5429_v52, %v5429_v52 }
 0x118   : > { %v1516_v21 = vrot.slane %v1478_v57, %v5316_v60  ;;  %v1520_v51 = vrot.slane %v1478_v57, %v5319_v63  ;;  %v1524_v19 = vrot.slane %v1480_v30, %v5316_v60  ;;  %v1528_v47 = vrot.slane %v1480_v30, %v5319_v63 }
 0x119   : > { %v1532_v8 = vrot.slane %v1463_v7, %v5316_v60  ;;  %v1415_v6 = vadd.f32 %v1414_v28, %v1402_v9  ;;  %v1423_v59 = vadd.f32 %v1422_v5, %v1403_v32  ;;  %v1536_v17 = vrot.slane %v1463_v7, %v5319_v63 }
 0x11a   : > { %v1589_v55 = vmul.f32 %v1508_v50, %v5160_v38  ;;  %v1540_v3 = vrot.slane %v5429_v52, %v5316_v60  ;;  %v1587_v35 = vmul.f32 %v1500_v46, %v5178_v43  ;;  %v1588_v39 = vmul.f32 %v1504_v45, %v5170_v41  ;;  %v6485_v46 = vld [vmem:[#allocation13_spill] sm:$0xff] }
 0x11b   : > { %v1590_v12 = vmul.f32 %v1512_v58, %v5152_v36  ;;  %v1544_v18 = vrot.slane %v5429_v52, %v5319_v63  ;;  %v1548_v44 = vrot.slane %v1479_v25, %v5316_v60  ;;  %v1552_v42 = vrot.slane %v1479_v25, %v5319_v63  ;;  %v6487_v25 = vld [vmem:[#allocation14_spill] sm:$0xff] }
 0x11c   : > { %v1556_v37 = vrot.slane %v5446_v23, %v5316_v60  ;;  %v1591_v38 = vmul.f32 %v1516_v21, %v5139_v33  ;;  %v1605_v7 = vadd.f32 %v1589_v55, %v1587_v35  ;;  %v1289_v43 = vcombine.low %v5377_v56, %v5387_v62  ;;  %v6488_v21 = vld [vmem:[#allocation15_spill] sm:$0xff] }
 0x11d   : > { %v1613_v0 = vadd.f32 %v1590_v12, %v1588_v39  ;;  %v1416_v41 = vadd.f32 %v1415_v6, %v1404_v13  ;;  %v1592_v36 = vmul.f32 %v1520_v51, %v5132_v31  ;;  %v1482_v52 = vcombine.low %v5385_v10, %v5393_v1  ;;  %v6493_v39 = vld [vmem:[#allocation8_spill] sm:$0xff] }
 0x11e   : > { %v1231_v49 = vadd.f32 %v5368_v4, %v5353_v48  ;;  %v1593_v26 = vmul.f32 %v1524_v19, %v5124_v29  ;;  %v1606_v57 = vadd.f32 %v1605_v7, %v1591_v38  ;;  %v1296_v33 = vrot.slane %v1289_v43, %v5312_v54  ;;  %v5524_v43 = vld [vmem:[%s5503_s22] sm:$0xff] }
 0x11f   : > { %v1367_v9 = vrot.slane %v5411_v40, %v5319_v63  ;;  %v1489_v56 = vrot.slane %v1482_v52, %v5312_v54  ;;  %v1407_v31 = vmul.f32 %v1359_v2, %v5070_v15  ;;  %v1424_v32 = vadd.f32 %v1423_v59, %v1405_v16  ;;  %v6483_v15 = vld [vmem:[#allocation10_spill] sm:$0xff]  ;;  %v6491_v59 = vld [vmem:[#allocation9_spill] sm:$0xff] }
 0x120   : > { %v1232_v62 = vadd.f32 %v1231_v49, %v5364_v14  ;;  %v1594_v10 = vmul.f32 %v1528_v47, %v5116_v27  ;;  %v1607_v1 = vadd.f32 %v1606_v57, %v1593_v26  ;;  %v1614_v30 = vadd.f32 %v1613_v0, %v1592_v36  ;;  %v6497_v49 = vld [vmem:[#allocation17_spill] sm:$0xff] }
 0x121   : > { %v1303_v48 = vrot.slane %v1296_v33, %v5312_v54  ;;  %v1595_v29 = vmul.f32 %v1532_v8, %v5105_v24  ;;  %v1596_v4 = vmul.f32 %v1536_v17, %v5097_v22  ;;  %v1425_v28 = vadd.f32 %v1424_v32, %v1407_v31  ;;  %v6484_v22 = vld [vmem:[#allocation3_spill] sm:$0xff]  ;;  %v6501_v32 = vld [vmem:[#allocation4_spill] sm:$0xff] }
 0x122   : > { %v1233_v13 = vadd.f32 %v1232_v62, %v5371_v53  ;;  %v1597_v14 = vmul.f32 %v1540_v3, %v5089_v20  ;;  %v1599_v2 = vmul.f32 %v1548_v44, %v6483_v15  ;;  %v1409_v5 = vmul.f32 %v1367_v9, %v5054_v11  ;;  %v6490_v8 = vld [vmem:[#allocation11_spill] sm:$0xff]  ;;  %v6492_v3 = vld [vmem:[#allocation16_spill] sm:$0xff]  ;;  %v6494_v44 = vld [vmem:[#allocation5_spill] sm:$0xff]  ;;  %6495 = vst [vmem:[#allocation3_spill] sm:$0xff] %v5524_v43 }
 0x123   : > { %v1375_v27 = vrot.slane %v1303_v48, %v5319_v63  ;;  %v1608_v50 = vadd.f32 %v1607_v1, %v1595_v29  ;;  %v1371_v16 = vrot.slane %v1303_v48, %v5316_v60  ;;  %v1496_v24 = vrot.slane %v1489_v56, %v5312_v54 }
 0x124   : > { %v6486_v45 = vrot.slane %v6485_v46, %v5319_v63  ;;  %v1426_v20 = vadd.f32 %v1425_v28, %v1409_v5  ;;  %v1560_v11 = vrot.slane %v5446_v23, %v5319_v63  ;;  %v1615_v53 = vadd.f32 %v1614_v30, %v1594_v10  ;;  %v6502_v30 = vld [vmem:[#allocation2_spill] sm:$0xff]  ;;  %v1644_v5 = vpop.trf.xlu0  ;;  %v5567_v46 = vld [vmem:[%s5029_s28 + $0xf0] sm:$0xff] }
 0x125   : > { %v1224_v51 = vadd.f32 %v6488_v21, %v6487_v25  ;;  %v1411_v47 = vmul.f32 %v1375_v27, %v6484_v22  ;;  %v1598_v6 = vmul.f32 %v1544_v18, %v6490_v8  ;;  %v1600_v17 = vmul.f32 %v1552_v42, %v6491_v59  ;;  %v5527_v18 = vld [vmem:[%s5503_s22 + $0x8] sm:$0xff]  ;;  %v5549_v27 = vld [vmem:[%s5029_s28 + $0x110] sm:$0xff]  ;;  %6509 = vst [vmem:[#allocation5_spill] sm:$0xff] %v5567_v46  ;;  %v5591_v25 = vld [vmem:[%s5029_s28 + $0xc0] sm:$0xff] }
 0x126   : > { %v1218_v58 = vmul.f32 %v6486_v45, %v6484_v22  ;;  %v1616_v55 = vadd.f32 %v1615_v53, %v1596_v4  ;;  %v1408_v23 = vmul.f32 %v1363_v34, %v6493_v39  ;;  %v1417_v12 = vadd.f32 %v1416_v41, %v5442_v61  ;;  %6496 = vst [vmem:[#allocation13_spill] sm:$0xff] %v5527_v18  ;;  %v6499_v34 = vld [vmem:[#allocation6_spill] sm:$0xff]  ;;  %v6500_v61 = vld [vmem:[#allocation7_spill] sm:$0xff]  ;;  %v5595_v21 = vld [vmem:[%s5029_s28 + $0xb8] sm:$0xff] }
 0x127   : > { %v1225_v35 = vadd.f32 %v1224_v51, %v6492_v3  ;;  %v1410_v38 = vmul.f32 %v1371_v16, %v6494_v44  ;;  %v1564_v7 = vrot.slane %v1496_v24, %v5316_v60  ;;  %v1568_v0 = vrot.slane %v1496_v24, %v5319_v63  ;;  %6504 = vst [vmem:[#allocation11_spill] sm:$0xff] %v5549_v27  ;;  %v5558_v16 = vld [vmem:[%s5029_s28 + $0x100] sm:$0xff]  ;;  %v5562_v24 = vld [vmem:[%s5029_s28 + $0xf8] sm:$0xff]  ;;  %v5571_v45 = vld [vmem:[%s5029_s28 + $0xe8] sm:$0xff] }
 0x128   : > { %v5509_v19 = vadd.f32 %v1233_v13, %v1218_v58  ;;  %v1609_v42 = vadd.f32 %v1608_v50, %v1597_v14  ;;  %v1427_v36 = vadd.f32 %v1426_v20, %v1411_v47  ;;  %v1617_v52 = vadd.f32 %v1616_v55, %v1598_v6  ;;  %v5553_v50 = vld [vmem:[%s5029_s28 + $0x108] sm:$0xff]  ;;  %6506 = vst [vmem:[#allocation16_spill] sm:$0xff] %v5558_v16  ;;  %v5575_v58 = vld [vmem:[%s5029_s28 + $0xe0] sm:$0xff]  ;;  %v5579_v20 = vld [vmem:[%s5029_s28 + $0xd8] sm:$0xff] }
 0x129   : > { %v5530_v26 = vadd.f32 %v1225_v35, %v6497_v49  ;;  %v1418_v40 = vadd.f32 %v1417_v12, %v1408_v23  ;;  %v1602_v57 = vmul.f32 %v1560_v11, %v6499_v34  ;;  %v1601_v41 = vmul.f32 %v1556_v37, %v6500_v61  ;;  %6505 = vst [vmem:[#allocation9_spill] sm:$0xff] %v5553_v50  ;;  %v5583_v11 = vld [vmem:[%s5029_s28 + $0xd0] sm:$0xff]  ;;  %v5587_v53 = vld [vmem:[%s5029_s28 + $0xc8] sm:$0xff]  ;;  %v5607_v8 = vld [vmem:[%s5029_s28 + $0xa0] sm:$0xff] }
 0x12a   : > { %6489 = vst [vmem:[#allocation10_spill] sm:$0xff] %v5509_v19  ;;  %v1610_v33 = vadd.f32 %v1609_v42, %v1599_v2  ;;  %v1618_v9 = vadd.f32 %v1617_v52, %v1600_v17  ;;  %v1622_v56 = vmul.f32 %v5509_v19, %v5527_v18  ;;  %v1603_v10 = vmul.f32 %v1564_v7, %v6501_v32  ;;  %v5545_v2 = vld [vmem:[%s5029_s28 + $0x118] sm:$0xff]  ;;  %v5599_v51 = vld [vmem:[%s5029_s28 + $0xb0] sm:$0xff]  ;;  %v5603_v47 = vld [vmem:[%s5029_s28 + $0xa8] sm:$0xff] }
 0x12b   : > { %6498 = vst [vmem:[#allocation14_spill] sm:$0xff] %v5530_v26  ;;  %v1419_v62 = vadd.f32 %v1418_v40, %v1410_v38  ;;  %v1621_v31 = vmul.f32 %v5530_v26, %v5524_v43  ;;  %v1604_v48 = vmul.f32 %v1568_v0, %v6502_v30  ;;  %6503 = vst [vmem:[#allocation15_spill] sm:$0xff] %v5545_v2  ;;  %v6508_v22 = vmov 0.0   ;;  %v5611_v6 = vld [vmem:[%s5029_s28 + $0x98] sm:$0xff]  ;;  %v5615_v59 = vld [vmem:[%s5029_s28 + $0x90] sm:$0xff] }
 0x12c   : > { %v1611_v1 = vadd.f32 %v1610_v33, %v1601_v41  ;;  %v1619_v29 = vadd.f32 %v1618_v9, %v1602_v57  ;;  %v1624_v37 = vadd.f32 %v1622_v56, %v1427_v36  ;;  %6507 = vst [vmem:[#allocation8_spill] sm:$0xff] %v5562_v24  ;;  %6510 = vst [vmem:[#allocation17_spill] sm:$0xff] %v5571_v45  ;;  %v5619_v17 = vld [vmem:[%s5034_s19 + $0x118] sm:$0xff]  ;;  %v4733_v55 = vld [vmem:[%s6419_s5 + $0x10] sm:$0xff] }
 0x12d   : > { %v1623_v4 = vadd.f32 %v1621_v31, %v1419_v62  ;;  %6511 = vst [vmem:[#allocation6_spill] sm:$0xff] %v5575_v58  ;;  %v5626_v3 = vld [vmem:[%s5034_s19 + $0x110] sm:$0xff]  ;;  %v5630_v35 = vld [vmem:[%s5034_s19 + $0x108] sm:$0xff]  ;;  %v5635_v39 = vld [vmem:[%s5034_s19 + $0x100] sm:$0xff] }
 0x12e   : > { %v1612_v13 = vadd.f32 %v1611_v1, %v1603_v10  ;;  %v1620_v28 = vadd.f32 %v1619_v29, %v1604_v48  ;;  %v5639_v23 = vld [vmem:[%s5034_s19 + $0xf8] sm:$0xff]  ;;  %v5647_v44 = vld [vmem:[%s5034_s19 + $0xf0] sm:$0xff]  ;;  %v5651_v38 = vld [vmem:[%s5034_s19 + $0xe8] sm:$0xff] }
 0x12f   : > { %v4734_v12 = vld [vmem:[%s6419_s5 + $0x18] sm:$0x1]  ;;  %v5655_v7 = vld [vmem:[%s5034_s19 + $0xe0] sm:$0xff]  ;;  %v5665_v42 = vld [vmem:[%s5034_s19 + $0xd0] sm:$0xff] }
 0x130   : > { %v5540_v14 = vadd.f32 %v1623_v4, %v1612_v13  ;;  %v5542_v15 = vadd.f32 %v1624_v37, %v1620_v28  ;;  %v5660_v0 = vld [vmem:[%s5034_s19 + $0xd8] sm:$0xff]  ;;  %v5669_v36 = vld [vmem:[%s5034_s19 + $0xc8] sm:$0xff]  ;;  %v5673_v52 = vld [vmem:[%s5034_s19 + $0xc0] sm:$0xff] }
 0x131   : > { %v5677_v49 = vld [vmem:[%s5034_s19 + $0xb8] sm:$0xff]  ;;  %v5681_v40 = vld [vmem:[%s5034_s19 + $0xb0] sm:$0xff]  ;;  %v5685_v34 = vld [vmem:[%s5034_s19 + $0xa8] sm:$0xff] }
 0x132   : > { %1694 = vmatprep.subr.mxu0 %v5542_v15  ;;  %v5689_v57 = vld [vmem:[%s5034_s19 + $0xa0] sm:$0xff]  ;;  %v5693_v61 = vld [vmem:[%s5034_s19 + $0x98] sm:$0xff]  ;;  %v5697_v41 = vld [vmem:[%s5034_s19 + $0x90] sm:$0xff] }
 0x133   : > { %1695 = vmatpush1.msra.mxu0 %v5540_v14  ;;  %v4741_v33 = vld [vmem:[%s6421_s7 + $0x10] sm:$0xff]  ;;  %v4742_v9 = vld [vmem:[%s6421_s7 + $0x18] sm:$0x1] }
 0x134   : > { %4691 = vmatmul.mubr.msk.f32.vlgmr.msra.gmra.mxu0 %vm1660_vm1, %v1644_v5  ;;  %1892 = vmatprep.subr.mxu0 %v5545_v2  ;;  %v6512_v4 = vld [vmem:[#allocation12_spill] sm:$0xff]  ;;  %v4732_v28 = vld [vmem:[%s6418_s4 + $0x18] sm:$0x1] }
 0x135   : > { %1893 = vmatpush1.msra.mxu0 %v5549_v27  ;;  %1942 = vmatprep.mubr.f32.mxu0 %v6508_v22  ;;  %v4731_v13 = vld [vmem:[%s6418_s4 + $0x10] sm:$0xff] }
 0x136   : > { %1894 = vmatprep.subr.mxu0 %v5553_v50  ;;  %v4747_v5 = vld [vmem:[%s6423_s9 + $0x10] sm:$0xff] }
 0x137   : > { %1895 = vmatpush1.msra.mxu0 %v5558_v16 }
 0x138   : > { %1896 = vmatprep.subr.mxu0 %v5562_v24 }
 0x139   : > { %1897 = vmatpush1.msra.mxu0 %v5567_v46 }
 0x13a   : > { %1898 = vmatprep.subr.mxu0 %v5571_v45 }
 0x13b   : > { %1899 = vmatpush1.msra.mxu0 %v5575_v58 }
 0x13c   : > { %1900 = vmatprep.subr.mxu0 %v5579_v20 }
 0x13d   : > { %1901 = vmatpush1.msra.mxu0 %v5583_v11 }
 0x13e   : > { %1902 = vmatprep.subr.mxu0 %v5587_v53 }
 0x13f   : > { %1903 = vmatpush1.msra.mxu0 %v5591_v25 }
 0x140   : > { %1904 = vmatprep.subr.mxu0 %v5595_v21 }
 0x141   : > { %1905 = vmatpush1.msra.mxu0 %v5599_v51 }
 0x142   : > { %1906 = vmatprep.subr.mxu0 %v5603_v47 }
 0x143   : > { %1907 = vmatpush1.msra.mxu0 %v5607_v8 }
 0x144   : > { %1908 = vmatprep.subr.mxu0 %v5611_v6 }
 0x145   : > { %1909 = vmatpush1.msra.mxu0 %v5615_v59 }
 0x146   : > { %2091 = vmatprep.subr.mxu0 %v5619_v17  ;;  %4735 = vmatmul.mubr.msk.f32.vlgmr.msra.gmra.mxu0 %vm665_vm0, %v4733_v55  ;;  %v4748_v55 = vld [vmem:[%s6423_s9 + $0x18] sm:$0x1] }
 0x147   : > { %2092 = vmatpush1.msra.mxu0 %v5626_v3  ;;  %1948 = vmatprep.mubr.f32.mxu0 %v6508_v22 }
 0x148   : > { %2093 = vmatprep.subr.mxu0 %v5630_v35 }
 0x149   : > { %2094 = vmatpush1.msra.mxu0 %v5635_v39 }
 0x14a   : > { %2095 = vmatprep.subr.mxu0 %v5639_v23  ;;  %4736 = vmatmul.mubr.msk.f32.gmra.mxu0 %vm665_vm0, %v4734_v12 }
 0x14b   : > { %2096 = vmatpush1.msra.mxu0 %v5647_v44  ;;  %2141 = vmatprep.mubr.f32.mxu0 %v6508_v22 }
 0x14c   : > { %2097 = vmatprep.subr.mxu0 %v5651_v38 }
 0x14d   : > { %2098 = vmatpush1.msra.mxu0 %v5655_v7 }
 0x14e   : > { %2099 = vmatprep.subr.mxu0 %v5660_v0 }
 0x14f   : > { %2100 = vmatpush1.msra.mxu0 %v5665_v42 }
 0x150   : > { %2101 = vmatprep.subr.mxu0 %v5669_v36 }
 0x151   : > { %2102 = vmatpush1.msra.mxu0 %v5673_v52 }
 0x152   : > { %2103 = vmatprep.subr.mxu0 %v5677_v49 }
 0x153   : > { %2104 = vmatpush1.msra.mxu0 %v5681_v40 }
 0x154   : > { %2105 = vmatprep.subr.mxu0 %v5685_v34 }
 0x155   : > { %2106 = vmatpush1.msra.mxu0 %v5689_v57 }
 0x156   : > { %2107 = vmatprep.subr.mxu0 %v5693_v61 }
 0x157   : > { %2108 = vmatpush1.msra.mxu0 %v5697_v41 }
 0x158   : > { %4745 = vmatmul.mubr.msk.f32.vlgmr.msra.gmra.mxu0 %vm665_vm0, %v4741_v33 }
 0x159   : > { %2147 = vmatprep.mubr.f32.mxu0 %v6508_v22 }
 0x15c   : > { %4746 = vmatmul.mubr.msk.f32.gmra.mxu0 %vm665_vm0, %v4742_v9 }
 0x15d   : > { %2939 = vmatprep.mubr.f32.mxu0 %v6508_v22 }
 0x1f4   : > { %v1730_v56 = vpop.f32.mrf.mxu0 }
 0x1f5   : > { %v4692_v62 = vmul.f32 -1.442695, %v1730_v56 }
 0x1f6   : > { %v1732_v31 = vpop.f32.mrf.mxu0 }
 0x1f7   : > { %4862 = vpow2.f32 %v4692_v62  ;;  %v4693_v32 = vmul.f32 -1.442695, %v1732_v31  ;;  %v5777_v62 = vpop.permute.xlu1 %2043 }
 0x1f9   : > { %4864 = vpow2.f32 %v4693_v32 }
 0x204   : > { %v4863_v10 = vpop.eup %4862 }
 0x205   : > { %v1741_v30 = vadd.f32 1.0, %v4863_v10  ;;  %v2064_v10 = vpop.permute.xlu1 %2063 }
 0x206   : > { %v4865_v1 = vpop.eup %4864  ;;  %v1944_v12 = vpop.f32.mrf.mxu0 }
 0x207   : > { %v1742_v48 = vadd.f32 1.0, %v4865_v1 }
 0x208   : > { %v5771_v33 = vpop.f32.mrf.mxu0 }
 0x209   : > { %4866 = vrcp.f32 %v1742_v48 }
 0x20a   : > { %4868 = vrcp.f32 %v1741_v30  ;;  %v5773_v9 = vpop.f32.mrf.mxu0 }
 0x20c   : > { %v5775_v56 = vpop.f32.mrf.mxu0 }
 0x216   : > { %v4867_v29 = vpop.eup %4866 }
 0x217   : > { %v4869_v37 = vpop.eup %4868  ;;  %1780 = vmatprep.subr.mxu1 %v4867_v29 }
 0x218   : > { %1781 = vmatpush1.msra.mxu1 %v4869_v37  ;;  %v2143_v31 = vpop.f32.mrf.mxu0 }
 0x219   : > { %4694 = vmatmul.mubr.msk.f32.vlgmr.msra.gmra.mxu1 %vm1660_vm1, %v6512_v4  ;;  %1975 = vmatprep.subr.mxu1 %v5619_v17  ;;  %v2144_v30 = vadd.f32 %v2143_v31, %v2064_v10 }
 0x21a   : > { %1976 = vmatpush1.msra.mxu1 %v5626_v3  ;;  %2025 = vmatprep.mubr.f32.mxu1 %v6508_v22  ;;  %v2145_v32 = vpop.f32.mrf.mxu0 }
 0x21b   : > { %1977 = vmatprep.subr.mxu1 %v5630_v35  ;;  %v2146_v1 = vadd.f32 %v2145_v32, %v2064_v10 }
 0x21c   : > { %1978 = vmatpush1.msra.mxu1 %v5635_v39 }
 0x21d   : > { %1979 = vmatprep.subr.mxu1 %v5639_v23  ;;  %v2450_v48 = vcombine.low %v2144_v30, %v2146_v1 }
 0x21e   : > { %1980 = vmatpush1.msra.mxu1 %v5647_v44 }
 0x21f   : > { %1981 = vmatprep.subr.mxu1 %v5651_v38  ;;  %v2458_v29 = vrot.slane %v2450_v48, %v5312_v54  ;;  %v2451_v48 = vcombine.high %v2144_v30, %v2146_v1 }
 0x220   : > { %1982 = vmatpush1.msra.mxu1 %v5655_v7 }
 0x221   : > { %1983 = vmatprep.subr.mxu1 %v5660_v0  ;;  %v2466_v37 = vcombine.high %v2458_v29, %v2458_v29 }
 0x222   : > { %1984 = vmatpush1.msra.mxu1 %v5665_v42 }
 0x223   : > { %1985 = vmatprep.subr.mxu1 %v5669_v36  ;;  %v2488_v4 = vrot.slane %v2466_v37, %v5312_v54 }
 0x224   : > { %1986 = vmatpush1.msra.mxu1 %v5673_v52 }
 0x225   : > { %1987 = vmatprep.subr.mxu1 %v5677_v49  ;;  %v2530_v32 = vrot.slane %v2488_v4, %v5319_v63  ;;  %v2526_v10 = vrot.slane %v2488_v4, %v5316_v60 }
 0x226   : > { %1988 = vmatpush1.msra.mxu1 %v5681_v40 }
 0x227   : > { %1989 = vmatprep.subr.mxu1 %v5685_v34  ;;  %v2607_v19 = vmul.f32 %v5689_v57, %v2526_v10 }
 0x228   : > { %1990 = vmatpush1.msra.mxu1 %v5689_v57 }
 0x229   : > { %1991 = vmatprep.subr.mxu1 %v5693_v61 }
 0x22a   : > { %1992 = vmatpush1.msra.mxu1 %v5697_v41 }
 0x22b   : > { %4737 = vmatmul.mubr.msk.f32.vlgmr.msra.gmra.mxu1 %vm665_vm0, %v4731_v13  ;;  %2190 = vmatprep.subr.mxu1 %v5545_v2 }
 0x22c   : > { %2031 = vmatprep.mubr.f32.mxu1 %v6508_v22  ;;  %2191 = vmatpush1.msra.mxu1 %v5549_v27 }
 0x22d   : > { %2192 = vmatprep.subr.mxu1 %v5553_v50 }
 0x22e   : > { %2193 = vmatpush1.msra.mxu1 %v5558_v16 }
 0x22f   : > { %4738 = vmatmul.mubr.msk.f32.gmra.mxu1 %vm665_vm0, %v4732_v28  ;;  %2194 = vmatprep.subr.mxu1 %v5562_v24  ;;  %v2474_v28 = vrot.slane %v2458_v29, %v5312_v54  ;;  %v5797_v29 = vpop.permute.xlu1 %2162 }
 0x230   : > { %2195 = vmatpush1.msra.mxu1 %v5567_v46  ;;  %2240 = vmatprep.mubr.f32.mxu1 %v6508_v22 }
 0x231   : > { %2196 = vmatprep.subr.mxu1 %v5571_v45  ;;  %v2496_v37 = vcombine.high %v2474_v28, %v2474_v28  ;;  %v2522_v26 = vrot.slane %v2474_v28, %v5319_v63 }
 0x232   : > { %2197 = vmatpush1.msra.mxu1 %v5575_v58 }
 0x233   : > { %2198 = vmatprep.subr.mxu1 %v5579_v20  ;;  %v2606_v1 = vmul.f32 %v5693_v61, %v2522_v26  ;;  %v2534_v30 = vrot.slane %v2496_v37, %v5316_v60  ;;  %v5807_v2 = vpop.permute.xlu1 %2048 }
 0x234   : > { %2199 = vmatpush1.msra.mxu1 %v5583_v11 }
 0x235   : > { %2200 = vmatprep.subr.mxu1 %v5587_v53  ;;  %v2609_v26 = vmul.f32 %v5681_v40, %v2534_v30 }
 0x236   : > { %2201 = vmatpush1.msra.mxu1 %v5591_v25 }
 0x237   : > { %2202 = vmatprep.subr.mxu1 %v5595_v21 }
 0x238   : > { %2203 = vmatpush1.msra.mxu1 %v5599_v51 }
 0x239   : > { %2204 = vmatprep.subr.mxu1 %v5603_v47 }
 0x23a   : > { %2205 = vmatpush1.msra.mxu1 %v5607_v8 }
 0x23b   : > { %2206 = vmatprep.subr.mxu1 %v5611_v6 }
 0x23c   : > { %2207 = vmatpush1.msra.mxu1 %v5615_v59 }
 0x23d   : > { %4751 = vmatmul.mubr.msk.f32.vlgmr.msra.gmra.mxu1 %vm665_vm0, %v4747_v5 }
 0x23e   : > { %2246 = vmatprep.mubr.f32.mxu1 %v6508_v22 }
 0x241   : > { %4752 = vmatmul.mubr.msk.f32.gmra.mxu1 %vm665_vm0, %v4748_v55 }
 0x242   : > { %3025 = vmatprep.mubr.f32.mxu1 %v6508_v22 }
 0x2d9   : > { %v1816_v13 = vpop.f32.mrf.mxu1 }
 0x2da   : > { %v5787_v5 = vmul.f32 %v1816_v13, %v5540_v14  ;;  %v2518_v14 = vrot.slane %v2474_v28, %v5316_v60  ;;  %v2608_v13 = vmul.f32 %v5685_v34, %v2530_v32  ;;  %v2149_v28 = vpop.f32.mrf.mxu0 }
 0x2db   : > { %v1818_v55 = vpop.f32.mrf.mxu1 }
 0x2dc   : > { %6513 = vst [vmem:[#allocation7_spill] sm:$0xff] %v5787_v5  ;;  %1823 = vst [vmem:[%s621_s23] sm:$0xff] %v5787_v5  ;;  %v5792_v31 = vmul.f32 %v1818_v55, %v5542_v15  ;;  %v2465_v5 = vrot.slane %v2451_v48, %v5312_v54  ;;  %v2498_v15 = vcombine.high %v2488_v4, %v2488_v4  ;;  %v2151_v16 = vpop.f32.mrf.mxu0 }
 0x2dd   : > { %v2538_v55 = vrot.slane %v2496_v37, %v5319_v63  ;;  %v2605_v22 = vmul.f32 %v5697_v41, %v2518_v14 }
 0x2de   : > { %6514 = vst [vmem:[#allocation4_spill] sm:$0xff] %v5792_v31  ;;  %1824 = vst [vmem:[%s621_s23 + $0x8] sm:$0xff] %v5792_v31  ;;  %v2631_v31 = vadd.f32 %v2608_v13, %v2606_v1  ;;  %v2467_v43 = vcombine.high %v2465_v5, %v2465_v5  ;;  %v2481_v32 = vrot.slane %v2465_v5, %v5312_v54 }
 0x2df   : > { %v2623_v27 = vadd.f32 %v2607_v19, %v2605_v22  ;;  %v2546_v10 = vrot.slane %v2498_v15, %v5319_v63  ;;  %v2610_v4 = vmul.f32 %v5677_v49, %v2538_v55  ;;  %v2542_v48 = vrot.slane %v2498_v15, %v5316_v60  ;;  %v2069_v22 = vpop.permute.xlu1 %2068 }
 0x2e0   : > { %v2495_v14 = vrot.slane %v2467_v43, %v5312_v54  ;;  %v2554_v13 = vrot.slane %v2481_v32, %v5319_v63  ;;  %v2550_v5 = vrot.slane %v2481_v32, %v5316_v60  ;;  %v2152_v24 = vadd.f32 %v2151_v16, %v2069_v22 }
 0x2e1   : > { %v2632_v18 = vadd.f32 %v2631_v31, %v2610_v4  ;;  %v2624_v37 = vadd.f32 %v2623_v27, %v2609_v26  ;;  %v2612_v19 = vmul.f32 %v5669_v36, %v2546_v10  ;;  %v2611_v1 = vmul.f32 %v5673_v52, %v2542_v48 }
 0x2e2   : > { %v2150_v30 = vadd.f32 %v2149_v28, %v2069_v22  ;;  %v2497_v27 = vcombine.high %v2481_v32, %v2481_v32  ;;  %v2562_v4 = vrot.slane %v2495_v14, %v5319_v63  ;;  %v2614_v43 = vmul.f32 %v5660_v0, %v2554_v13 }
 0x2e3   : > { %v2633_v55 = vadd.f32 %v2632_v18, %v2612_v19  ;;  %v2625_v46 = vadd.f32 %v2624_v37, %v2611_v1  ;;  %v2558_v10 = vrot.slane %v2495_v14, %v5316_v60  ;;  %v2613_v45 = vmul.f32 %v5665_v42, %v2550_v5 }
 0x2e4   : > { %v2500_v48 = vcombine.low %v2150_v30, %v2152_v24  ;;  %v2570_v32 = vrot.slane %v2497_v27, %v5319_v63  ;;  %v2616_v37 = vmul.f32 %v5651_v38, %v2562_v4  ;;  %v2566_v22 = vrot.slane %v2497_v27, %v5316_v60 }
 0x2e5   : > { %v2634_v58 = vadd.f32 %v2633_v55, %v2614_v43  ;;  %v2626_v28 = vadd.f32 %v2625_v46, %v2613_v45  ;;  %v2615_v5 = vmul.f32 %v5655_v7, %v2558_v10 }
 0x2e6   : > { %v2507_v24 = vrot.slane %v2500_v48, %v5312_v54  ;;  %v2617_v4 = vmul.f32 %v5647_v44, %v2566_v22 }
 0x2e7   : > { %v2635_v55 = vadd.f32 %v2634_v58, %v2616_v37 }
 0x2e8   : > { %v5841_v10 = vrot.slane %v2507_v24, %v5312_v54 }
 0x2ea   : > { %v2586_v24 = vrot.slane %v5841_v10, %v5319_v63 }
 0x2eb   : > { %v2027_v50 = vpop.f32.mrf.mxu1 }
 0x2ec   : > { %v2028_v15 = vadd.f32 %v2027_v50, %v1944_v12  ;;  %v2499_v12 = vcombine.high %v2495_v14, %v2495_v14  ;;  %v2627_v14 = vadd.f32 %v2626_v28, %v2615_v5  ;;  %v2582_v5 = vrot.slane %v5841_v10, %v5316_v60 }
 0x2ed   : > { %v2029_v31 = vpop.f32.mrf.mxu1 }
 0x2ee   : > { %v2030_v26 = vadd.f32 %v2029_v31, %v5771_v33  ;;  %v2051_v18 = vadd.f32 %v5777_v62, %v2028_v15  ;;  %v2578_v45 = vrot.slane %v2499_v12, %v5319_v63  ;;  %v2618_v31 = vmul.f32 %v5639_v23, %v2570_v32 }
 0x2ef   : > { %v2033_v16 = vpop.f32.mrf.mxu1  ;;  %v2574_v27 = vrot.slane %v2499_v12, %v5316_v60  ;;  %v2628_v32 = vadd.f32 %v2627_v14, %v2617_v4 }
 0x2f0   : > { %v2052_v50 = vadd.f32 %v5777_v62, %v2030_v26  ;;  %v2034_v26 = vadd.f32 %v2033_v16, %v5773_v9  ;;  %v2636_v48 = vadd.f32 %v2635_v55, %v2618_v31  ;;  %v2620_v28 = vmul.f32 %v5630_v35, %v2578_v45 }
 0x2f1   : > { %v2035_v33 = vpop.f32.mrf.mxu1  ;;  %v2619_v22 = vmul.f32 %v5635_v39, %v2574_v27 }
 0x2f2   : > { %v2257_v13 = vcombine.low %v2051_v18, %v2052_v50  ;;  %v2258_v19 = vcombine.high %v2051_v18, %v2052_v50  ;;  %v2036_v46 = vadd.f32 %v2035_v33, %v5775_v56  ;;  %v2053_v33 = vadd.f32 %v5807_v2, %v2034_v26 }
 0x2f3   : > { %v5862_v45 = vadd.f32 %v2628_v32, %v2619_v22 }
 0x2f4   : > { %v2265_v1 = vrot.slane %v2257_v13, %v5312_v54  ;;  %v2272_v62 = vrot.slane %v2258_v19, %v5312_v54  ;;  %v2054_v50 = vadd.f32 %v5807_v2, %v2036_v46 }
 0x2f6   : > { %v2273_v15 = vcombine.high %v2265_v1, %v2265_v1  ;;  %v2281_v30 = vrot.slane %v2265_v1, %v5312_v54  ;;  %v2274_v43 = vcombine.high %v2272_v62, %v2272_v62  ;;  %v2288_v18 = vrot.slane %v2272_v62, %v5312_v54 }
 0x2f7   : > { %v5859_v62 = vadd.f32 %v2636_v48, %v2620_v28  ;;  %v2307_v46 = vcombine.low %v2053_v33, %v2054_v50 }
 0x2f8   : > { %v2295_v58 = vrot.slane %v2273_v15, %v5312_v54  ;;  %v2303_v56 = vcombine.high %v2281_v30, %v2281_v30  ;;  %v2325_v12 = vrot.slane %v2281_v30, %v5316_v60  ;;  %v2329_v37 = vrot.slane %v2281_v30, %v5319_v63 }
 0x2f9   : > { %v2302_v13 = vrot.slane %v2274_v43, %v5312_v54  ;;  %v2304_v55 = vcombine.high %v2288_v18, %v2288_v18  ;;  %v2357_v26 = vrot.slane %v2288_v18, %v5316_v60 }
 0x2fa   : > { %v2333_v9 = vrot.slane %v2295_v58, %v5316_v60  ;;  %v2337_v16 = vrot.slane %v2295_v58, %v5319_v63  ;;  %v2305_v19 = vcombine.high %v2295_v58, %v2295_v58  ;;  %v2341_v1 = vrot.slane %v2303_v56, %v5316_v60 }
 0x2fb   : > { %v2345_v2 = vrot.slane %v2303_v56, %v5319_v63  ;;  %v2412_v15 = vmul.f32 %v5697_v41, %v2325_v12  ;;  %v2413_v30 = vmul.f32 %v5693_v61, %v2329_v37  ;;  %v2306_v4 = vcombine.high %v2302_v13, %v2302_v13 }
 0x2fc   : > { %v2414_v14 = vmul.f32 %v5689_v57, %v2333_v9  ;;  %v2415_v31 = vmul.f32 %v5685_v34, %v2337_v16  ;;  %v2349_v43 = vrot.slane %v2305_v19, %v5316_v60  ;;  %v2361_v58 = vrot.slane %v2288_v18, %v5319_v63 }
 0x2fd   : > { %v2242_v27 = vpop.f32.mrf.mxu1  ;;  %v2353_v57 = vrot.slane %v2305_v19, %v5319_v63  ;;  %v2416_v48 = vmul.f32 %v5681_v40, %v2341_v1  ;;  %v2365_v41 = vrot.slane %v2302_v13, %v5316_v60  ;;  %v2314_v61 = vrot.slane %v2307_v46, %v5312_v54 }
 0x2fe   : > { %v2430_v50 = vadd.f32 %v2414_v14, %v2412_v15  ;;  %v2438_v56 = vadd.f32 %v2415_v31, %v2413_v30  ;;  %v2243_v34 = vadd.f32 %v2242_v27, %v5797_v29  ;;  %v2369_v12 = vrot.slane %v2302_v13, %v5319_v63 }
 0x2ff   : > { %v2244_v28 = vpop.f32.mrf.mxu1  ;;  %v2373_v37 = vrot.slane %v2304_v55, %v5316_v60  ;;  %v2417_v18 = vmul.f32 %v5677_v49, %v2345_v2  ;;  %v2377_v40 = vrot.slane %v2304_v55, %v5319_v63  ;;  %v2418_v19 = vmul.f32 %v5673_v52, %v2349_v43 }
 0x300   : > { %v2245_v32 = vadd.f32 %v2244_v28, %v5797_v29  ;;  %v2431_v9 = vadd.f32 %v2430_v50, %v2416_v48  ;;  %v2381_v1 = vrot.slane %v2306_v4, %v5316_v60  ;;  %v2419_v14 = vmul.f32 %v5669_v36, %v2353_v57 }
 0x301   : > { %v2248_v16 = vpop.f32.mrf.mxu1  ;;  %v2439_v46 = vadd.f32 %v2438_v56, %v2417_v18  ;;  %v2321_v29 = vrot.slane %v2314_v61, %v5312_v54  ;;  %v2420_v13 = vmul.f32 %v5665_v42, %v2357_v26  ;;  %v2421_v55 = vmul.f32 %v5660_v0, %v2361_v58  ;;  %v2168_v26 = vpop.permute.xlu1 %2167 }
 0x302   : > { %v2643_v33 = vcombine.low %v2243_v34, %v2245_v32  ;;  %v2644_v22 = vcombine.high %v2243_v34, %v2245_v32  ;;  %v2432_v15 = vadd.f32 %v2431_v9, %v2418_v19  ;;  %v2422_v52 = vmul.f32 %v5655_v7, %v2365_v41 }
 0x303   : > { %v2423_v30 = vmul.f32 %v5651_v38, %v2369_v12  ;;  %v2424_v31 = vmul.f32 %v5647_v44, %v2373_v37  ;;  %v2250_v27 = vpop.f32.mrf.mxu1  ;;  %v2385_v57 = vrot.slane %v2306_v4, %v5319_v63  ;;  %v2425_v42 = vmul.f32 %v5639_v23, %v2377_v40 }
 0x304   : > { %v2651_v49 = vrot.slane %v2643_v33, %v5312_v54  ;;  %v2658_v2 = vrot.slane %v2644_v22, %v5312_v54  ;;  %v2440_v48 = vadd.f32 %v2439_v46, %v2419_v14  ;;  %v2389_v50 = vrot.slane %v2321_v29, %v5316_v60 }
 0x305   : > { %v2426_v0 = vmul.f32 %v5635_v39, %v2381_v1  ;;  %v2433_v7 = vadd.f32 %v2432_v15, %v2420_v13  ;;  %v2251_v44 = vadd.f32 %v2250_v27, %v2168_v26  ;;  %v2393_v28 = vrot.slane %v2321_v29, %v5319_v63 }
 0x306   : > { %v2659_v36 = vcombine.high %v2651_v49, %v2651_v49  ;;  %v2667_v43 = vrot.slane %v2651_v49, %v5312_v54  ;;  %v2660_v56 = vcombine.high %v2658_v2, %v2658_v2  ;;  %v2674_v41 = vrot.slane %v2658_v2, %v5312_v54 }
 0x307   : > { %v2249_v61 = vadd.f32 %v2248_v16, %v2168_v26  ;;  %v2441_v39 = vadd.f32 %v2440_v48, %v2421_v55  ;;  %v2427_v9 = vmul.f32 %v5630_v35, %v2385_v57  ;;  %v2434_v40 = vadd.f32 %v2433_v7, %v2422_v52 }
 0x308   : > { %v2681_v38 = vrot.slane %v2659_v36, %v5312_v54  ;;  %v2689_v58 = vcombine.high %v2667_v43, %v2667_v43  ;;  %v2711_v4 = vrot.slane %v2667_v43, %v5316_v60  ;;  %v2715_v34 = vrot.slane %v2667_v43, %v5319_v63 }
 0x309   : > { %v2688_v37 = vrot.slane %v2660_v56, %v5312_v54  ;;  %v2428_v19 = vmul.f32 %v5626_v3, %v2389_v50  ;;  %v2693_v16 = vcombine.low %v2249_v61, %v2251_v44  ;;  %v2690_v22 = vcombine.high %v2674_v41, %v2674_v41 }
 0x30a   : > { %v2691_v23 = vcombine.high %v2681_v38, %v2681_v38  ;;  %v2719_v32 = vrot.slane %v2681_v38, %v5316_v60  ;;  %v2723_v12 = vrot.slane %v2681_v38, %v5319_v63  ;;  %v2727_v18 = vrot.slane %v2689_v58, %v5316_v60 }
 0x30b   : > { %v2731_v33 = vrot.slane %v2689_v58, %v5319_v63  ;;  %v2429_v46 = vmul.f32 %v5619_v17, %v2393_v28  ;;  %v2798_v13 = vmul.f32 %v5615_v59, %v2711_v4  ;;  %v2799_v15 = vmul.f32 %v5611_v6, %v2715_v34  ;;  %v6516_v34 = vld [vmem:[#allocation17_spill] sm:$0xff] }
 0x30c   : > { %v2735_v1 = vrot.slane %v2691_v23, %v5316_v60  ;;  %v2800_v14 = vmul.f32 %v5607_v8, %v2719_v32  ;;  %v2739_v29 = vrot.slane %v2691_v23, %v5319_v63  ;;  %v2801_v35 = vmul.f32 %v5603_v47, %v2723_v12 }
 0x30d   : > { %v2692_v49 = vcombine.high %v2688_v37, %v2688_v37  ;;  %v2743_v2 = vrot.slane %v2674_v41, %v5316_v60  ;;  %v2747_v55 = vrot.slane %v2674_v41, %v5319_v63  ;;  %v2802_v52 = vmul.f32 %v5599_v51, %v2727_v18 }
 0x30e   : > { %v2803_v27 = vmul.f32 %v5595_v21, %v2731_v33  ;;  %v2816_v8 = vadd.f32 %v2800_v14, %v2798_v13  ;;  %v2824_v36 = vadd.f32 %v2801_v35, %v2799_v15  ;;  %v2700_v43 = vrot.slane %v2693_v16, %v5312_v54  ;;  %v6521_v13 = vld [vmem:[#allocation13_spill] sm:$0xff] }
 0x30f   : > { %v2751_v57 = vrot.slane %v2688_v37, %v5316_v60  ;;  %v2755_v59 = vrot.slane %v2688_v37, %v5319_v63  ;;  %v2804_v6 = vmul.f32 %v5591_v25, %v2735_v1  ;;  %v2442_v47 = vadd.f32 %v2441_v39, %v2423_v30  ;;  %v6519_v1 = vld [vmem:[#allocation9_spill] sm:$0xff] }
 0x310   : > { %v2805_v26 = vmul.f32 %v5587_v53, %v2739_v29  ;;  %v2817_v48 = vadd.f32 %v2816_v8, %v2802_v52  ;;  %v2825_v50 = vadd.f32 %v2824_v36, %v2803_v27  ;;  %v2435_v56 = vadd.f32 %v2434_v40, %v2424_v31  ;;  %v6515_v31 = vld [vmem:[#allocation6_spill] sm:$0xff]  ;;  %v6524_v52 = vld [vmem:[#allocation15_spill] sm:$0xff] }
 0x311   : > { %v2759_v51 = vrot.slane %v2690_v22, %v5316_v60  ;;  %v2763_v21 = vrot.slane %v2690_v22, %v5319_v63  ;;  %v2806_v7 = vmul.f32 %v5583_v11, %v2743_v2  ;;  %v2443_v38 = vadd.f32 %v2442_v47, %v2425_v42  ;;  %v6517_v11 = vld [vmem:[#allocation5_spill] sm:$0xff]  ;;  %v2856_v47 = vpop.trf.xlu1 }
 0x312   : > { %v2807_v58 = vmul.f32 %v5579_v20, %v2747_v55  ;;  %v2818_v44 = vadd.f32 %v2817_v48, %v2804_v6  ;;  %v2707_v28 = vrot.slane %v2700_v43, %v5312_v54  ;;  %v2826_v41 = vadd.f32 %v2825_v50, %v2805_v26  ;;  %v6518_v20 = vld [vmem:[#allocation8_spill] sm:$0xff] }
 0x313   : > { %v2767_v25 = vrot.slane %v2692_v49, %v5316_v60  ;;  %v2444_v30 = vadd.f32 %v2443_v38, %v2427_v9  ;;  %v2771_v53 = vrot.slane %v2692_v49, %v5319_v63  ;;  %v2436_v4 = vadd.f32 %v2435_v56, %v2426_v0  ;;  %v6522_v49 = vld [vmem:[#allocation3_spill] sm:$0xff] }
 0x314   : > { %v2808_v61 = vmul.f32 %v6515_v31, %v2751_v57  ;;  %v2819_v23 = vadd.f32 %v2818_v44, %v2806_v7  ;;  %v2809_v32 = vmul.f32 %v6516_v34, %v2755_v59  ;;  %v2827_v12 = vadd.f32 %v2826_v41, %v2807_v58  ;;  %v6526_v44 = vld [vmem:[#allocation10_spill] sm:$0xff]  ;;  %v4886_v31 = vld [vmem:[%s5266_s21 + $0x8] sm:$0xff]  ;;  %v5986_v34 = vld [vmem:[%s5034_s19 + $0x198] sm:$0xff] }
 0x315   : > { %v2810_v42 = vmul.f32 %v6517_v11, %v2759_v51  ;;  %v5935_v39 = vadd.f32 %v2444_v30, %v2429_v46  ;;  %v2811_v37 = vmul.f32 %v6518_v20, %v2763_v21  ;;  %v5938_v18 = vadd.f32 %v2436_v4, %v2428_v19  ;;  %v6520_v19 = vld [vmem:[#allocation16_spill] sm:$0xff]  ;;  %v6529_v30 = vld [vmem:[#allocation7_spill] sm:$0xff]  ;;  %v5999_v11 = vld [vmem:[%s5034_s19 + $0x180] sm:$0xff] }
 0x316   : > { %v2775_v40 = vrot.slane %v2707_v28, %v5316_v60  ;;  %v2779_v9 = vrot.slane %v2707_v28, %v5319_v63  ;;  %v2828_v33 = vadd.f32 %v2827_v12, %v2809_v32  ;;  %v2820_v0 = vadd.f32 %v2819_v23, %v2808_v61  ;;  %v6527_v28 = vld [vmem:[#allocation4_spill] sm:$0xff]  ;;  %v5973_v4 = vld [vmem:[%s5034_s19 + $0x1a8] sm:$0xff]  ;;  %v1827_v61 = vld [vmem:[%s6425_s11] sm:$0xff] }
 0x317   : > { %v2621_v16 = vmul.f32 %v5626_v3, %v2582_v5  ;;  %v2622_v22 = vmul.f32 %v5619_v17, %v2586_v24  ;;  %v2813_v14 = vmul.f32 %v6519_v1, %v2771_v53  ;;  %v2812_v46 = vmul.f32 %v6520_v19, %v2767_v25  ;;  %v6523_v5 = vld [vmem:[#allocation11_spill] sm:$0xff]  ;;  %v6528_v25 = vld [vmem:[#allocation14_spill] sm:$0xff]  ;;  %6530 = vst [vmem:[#allocation2_spill] sm:$0xff] %v5973_v4  ;;  %v5990_v32 = vld [vmem:[%s5034_s19 + $0x190] sm:$0xff] }
 0x318   : > { %v2829_v29 = vadd.f32 %v2828_v33, %v2811_v37  ;;  %v2833_v15 = vmul.f32 %v5935_v39, %v6521_v13  ;;  %v2821_v35 = vadd.f32 %v2820_v0, %v2810_v42  ;;  %v2832_v2 = vmul.f32 %v5938_v18, %v6522_v49  ;;  %v5983_v23 = vld [vmem:[%s5034_s19 + $0x1a0] sm:$0xff]  ;;  %v5994_v12 = vld [vmem:[%s5034_s19 + $0x188] sm:$0xff]  ;;  %v6003_v42 = vld [vmem:[%s5034_s19 + $0x178] sm:$0xff] }
 0x319   : > { %v2638_v55 = vadd.f32 %v5859_v62, %v2622_v22  ;;  %v2630_v3 = vadd.f32 %v5862_v45, %v2621_v16  ;;  %v2814_v10 = vmul.f32 %v6523_v5, %v2775_v40  ;;  %v2815_v17 = vmul.f32 %v6524_v52, %v2779_v9  ;;  %v6007_v20 = vld [vmem:[%s5034_s19 + $0x170] sm:$0xff]  ;;  %v6011_v37 = vld [vmem:[%s5034_s19 + $0x168] sm:$0xff]  ;;  %v6015_v40 = vld [vmem:[%s5034_s19 + $0x160] sm:$0xff] }
 0x31a   : > { %v2830_v24 = vadd.f32 %v2829_v29, %v2813_v14  ;;  %v2822_v27 = vadd.f32 %v2821_v35, %v2812_v46  ;;  %v6525_v62 = vmov 0.0   ;;  %v1826_v41 = vmul.f32 %v6527_v28, %v6526_v44  ;;  %v6019_v9 = vld [vmem:[%s5034_s19 + $0x158] sm:$0xff]  ;;  %v6023_v33 = vld [vmem:[%s5034_s19 + $0x150] sm:$0xff]  ;;  %v6027_v0 = vld [vmem:[%s5034_s19 + $0x148] sm:$0xff] }
 0x31b   : > { %v2835_v36 = vadd.f32 %v2833_v15, %v2638_v55  ;;  %v2834_v57 = vadd.f32 %v2832_v2, %v2630_v3  ;;  %v1825_v53 = vmul.f32 %v6529_v30, %v6528_v25  ;;  %v6031_v16 = vld [vmem:[%s5034_s19 + $0x140] sm:$0xff]  ;;  %v6035_v22 = vld [vmem:[%s5034_s19 + $0x138] sm:$0xff]  ;;  %v6039_v1 = vld [vmem:[%s5034_s19 + $0x130] sm:$0xff] }
 0x31c   : > { %v2831_v8 = vadd.f32 %v2830_v24, %v2815_v17  ;;  %v2823_v43 = vadd.f32 %v2822_v27, %v2814_v10  ;;  %v6043_v14 = vld [vmem:[%s5034_s19 + $0x128] sm:$0xff]  ;;  %v6047_v19 = vld [vmem:[%s5034_s19 + $0x120] sm:$0xff]  ;;  %v6062_v15 = vld [vmem:[%s5029_s28 + $0x198] sm:$0xff] }
 0x31d   : > { %v6051_v46 = vld [vmem:[%s5029_s28 + $0x1a8] sm:$0xff]  ;;  %v4797_v29 = vld [vmem:[%s6418_s4 + $0x20] sm:$0xff]  ;;  %v6067_v35 = vld [vmem:[%s5029_s28 + $0x190] sm:$0xff] }
 0x31e   : > { %v5960_v59 = vadd.f32 %v2835_v36, %v2831_v8  ;;  %v5962_v6 = vadd.f32 %v2834_v57, %v2823_v43  ;;  %6531 = vst [vmem:[#allocation12_spill] sm:$0xff] %v6051_v46  ;;  %v6058_v13 = vld [vmem:[%s5029_s28 + $0x1a0] sm:$0xff]  ;;  %v6071_v49 = vld [vmem:[%s5029_s28 + $0x188] sm:$0xff]  ;;  %v6083_v3 = vld [vmem:[%s5029_s28 + $0x178] sm:$0xff] }
 0x31f   : > { %6532 = vst [vmem:[#allocation6_spill] sm:$0xff] %v6058_v13  ;;  %v4798_v2 = vld [vmem:[%s6418_s4 + $0x28] sm:$0x1]  ;;  %v6079_v55 = vld [vmem:[%s5029_s28 + $0x180] sm:$0xff]  ;;  %v6087_v5 = vld [vmem:[%s5029_s28 + $0x170] sm:$0xff] }
 0x320   : > { %2905 = vmatprep.subr.mxu0 %v5960_v59  ;;  %v6092_v10 = vld [vmem:[%s5029_s28 + $0x168] sm:$0xff]  ;;  %v6097_v52 = vld [vmem:[%s5029_s28 + $0x160] sm:$0xff]  ;;  %v6101_v17 = vld [vmem:[%s5029_s28 + $0x158] sm:$0xff] }
 0x321   : > { %2906 = vmatpush1.msra.mxu0 %v5962_v6  ;;  %v6105_v24 = vld [vmem:[%s5029_s28 + $0x150] sm:$0xff]  ;;  %v6109_v27 = vld [vmem:[%s5029_s28 + $0x148] sm:$0xff]  ;;  %v6113_v8 = vld [vmem:[%s5029_s28 + $0x140] sm:$0xff] }
 0x322   : > { %4754 = vmatmul.mubr.msk.f32.vlgmr.msra.gmra.mxu0 %vm1660_vm1, %v2856_v47  ;;  %v6117_v36 = vld [vmem:[%s5029_s28 + $0x138] sm:$0xff]  ;;  %v6121_v43 = vld [vmem:[%s5029_s28 + $0x130] sm:$0xff]  ;;  %v6125_v57 = vld [vmem:[%s5029_s28 + $0x128] sm:$0xff] }
 0x323   : > { %3105 = vmatprep.mubr.f32.mxu0 %v6525_v62  ;;  %v6129_v47 = vld [vmem:[%s5029_s28 + $0x120] sm:$0xff] }
 0x3e2   : > { %v2941_v45 = vpop.f32.mrf.mxu0 }
 0x3e3   : > { %v4755_v26 = vmul.f32 -1.442695, %v2941_v45  ;;  %v4813_v45 = vld [vmem:[%s6423_s9 + $0x20] sm:$0xff] }
 0x3e4   : > { %v2943_v48 = vpop.f32.mrf.mxu0 }
 0x3e5   : > { %4870 = vpow2.f32 %v4755_v26  ;;  %v4756_v50 = vmul.f32 -1.442695, %v2943_v48  ;;  %v4814_v26 = vld [vmem:[%s6423_s9 + $0x28] sm:$0x1]  ;;  %v6145_v48 = vld [vmem:[%s5266_s21 + $0x10] sm:$0xff] }
 0x3e6   : > { %6533 = vst [vmem:[#allocation17_spill] sm:$0xff] %v6145_v48  ;;  %4198 = vxpose.xlu0.b32.start.end [1/1] (short) (narrow) %v6145_v48, 8 }
 0x3e7   : > { %4872 = vpow2.f32 %v4756_v50 }
 0x3f2   : > { %v4871_v56 = vpop.eup %4870 }
 0x3f3   : > { %v2952_v21 = vadd.f32 1.0, %v4871_v56 }
 0x3f4   : > { %v4873_v51 = vpop.eup %4872 }
 0x3f5   : > { %v2953_v7 = vadd.f32 1.0, %v4873_v51 }
 0x3f7   : > { %4874 = vrcp.f32 %v2953_v7 }
 0x3f8   : > { %4876 = vrcp.f32 %v2952_v21 }
 0x404   : > { %v4875_v38 = vpop.eup %4874 }
 0x405   : > { %v4877_v58 = vpop.eup %4876  ;;  %2991 = vmatprep.subr.mxu1 %v4875_v38 }
 0x406   : > { %2992 = vmatpush1.msra.mxu1 %v4877_v58  ;;  %v4758_v58 = vld [vmem:[%s6425_s11 + $0x8] sm:$0xff] }
 0x407   : > { %4757 = vmatmul.mubr.msk.f32.vlgmr.msra.gmra.mxu1 %vm1660_vm1, %v4886_v31  ;;  %3145 = vmatprep.subr.mxu1 %v1826_v41  ;;  %v3402_v31 = vpop.permute.xlu0 %3401 }
 0x408   : > { %3146 = vmatpush1.msra.mxu1 %v1825_v53  ;;  %3179 = vmatprep.mubr.f32.mxu1 %v6525_v62 }
 0x409   : > { %3333 = vmatprep.subr.mxu1 %v5973_v4 }
 0x40b   : > { %4760 = vmatmul.mubr.msk.f32.vlgmr.msra.gmra.mxu1 %vm1660_vm1, %v1827_v61 }
 0x40c   : > { %3334 = vmatpush1.msra.mxu1 %v5983_v23  ;;  %3383 = vmatprep.mubr.f32.mxu1 %v6525_v62 }
 0x40d   : > { %3335 = vmatprep.subr.mxu1 %v5986_v34 }
 0x40e   : > { %3336 = vmatpush1.msra.mxu1 %v5990_v32 }
 0x40f   : > { %3337 = vmatprep.subr.mxu1 %v5994_v12 }
 0x410   : > { %3338 = vmatpush1.msra.mxu1 %v5999_v11 }
 0x411   : > { %3339 = vmatprep.subr.mxu1 %v6003_v42 }
 0x412   : > { %3340 = vmatpush1.msra.mxu1 %v6007_v20 }
 0x413   : > { %3341 = vmatprep.subr.mxu1 %v6011_v37 }
 0x414   : > { %3342 = vmatpush1.msra.mxu1 %v6015_v40 }
 0x415   : > { %3343 = vmatprep.subr.mxu1 %v6019_v9 }
 0x416   : > { %3344 = vmatpush1.msra.mxu1 %v6023_v33 }
 0x417   : > { %3345 = vmatprep.subr.mxu1 %v6027_v0 }
 0x418   : > { %3346 = vmatpush1.msra.mxu1 %v6031_v16 }
 0x419   : > { %3347 = vmatprep.subr.mxu1 %v6035_v22 }
 0x41a   : > { %3348 = vmatpush1.msra.mxu1 %v6039_v1 }
 0x41b   : > { %3349 = vmatprep.subr.mxu1 %v6043_v14 }
 0x41c   : > { %3350 = vmatpush1.msra.mxu1 %v6047_v19 }
 0x41d   : > { %3548 = vmatprep.subr.mxu1 %v6051_v46  ;;  %4803 = vmatmul.mubr.msk.f32.vlgmr.msra.gmra.mxu1 %vm665_vm0, %v4797_v29 }
 0x41e   : > { %3549 = vmatpush1.msra.mxu1 %v6058_v13  ;;  %3389 = vmatprep.mubr.f32.mxu1 %v6525_v62 }
 0x41f   : > { %3550 = vmatprep.subr.mxu1 %v6062_v15 }
 0x420   : > { %3551 = vmatpush1.msra.mxu1 %v6067_v35 }
 0x421   : > { %3552 = vmatprep.subr.mxu1 %v6071_v49  ;;  %4804 = vmatmul.mubr.msk.f32.gmra.mxu1 %vm665_vm0, %v4798_v2  ;;  %v3521_v2 = vpop.permute.xlu0 %3520 }
 0x422   : > { %3553 = vmatpush1.msra.mxu1 %v6079_v55  ;;  %3598 = vmatprep.mubr.f32.mxu1 %v6525_v62 }
 0x423   : > { %3554 = vmatprep.subr.mxu1 %v6083_v3 }
 0x424   : > { %3555 = vmatpush1.msra.mxu1 %v6087_v5 }
 0x425   : > { %3556 = vmatprep.subr.mxu1 %v6092_v10 }
 0x426   : > { %3557 = vmatpush1.msra.mxu1 %v6097_v52 }
 0x427   : > { %3558 = vmatprep.subr.mxu1 %v6101_v17 }
 0x428   : > { %3559 = vmatpush1.msra.mxu1 %v6105_v24 }
 0x429   : > { %3560 = vmatprep.subr.mxu1 %v6109_v27 }
 0x42a   : > { %3561 = vmatpush1.msra.mxu1 %v6113_v8 }
 0x42b   : > { %3562 = vmatprep.subr.mxu1 %v6117_v36 }
 0x42c   : > { %3563 = vmatpush1.msra.mxu1 %v6121_v43 }
 0x42d   : > { %3564 = vmatprep.subr.mxu1 %v6125_v57 }
 0x42e   : > { %3565 = vmatpush1.msra.mxu1 %v6129_v47 }
 0x42f   : > { %4817 = vmatmul.mubr.msk.f32.vlgmr.msra.gmra.mxu1 %vm665_vm0, %v4813_v45 }
 0x430   : > { %3604 = vmatprep.mubr.f32.mxu1 %v6525_v62 }
 0x433   : > { %4818 = vmatmul.mubr.msk.f32.gmra.mxu1 %vm665_vm0, %v4814_v26 }
 0x434   : > { %4383 = vmatprep.mubr.f32.mxu1 %v6525_v62 }
 0x4c7   : > { %v3027_v50 = vpop.f32.mrf.mxu1 }
 0x4c8   : > { %v3032_v56 = vmul.f32 %v3027_v50, %v5962_v6  ;;  %v4808_v6 = vld [vmem:[%s6421_s7 + $0x28] sm:$0x1] }
 0x4c9   : > { %v3029_v51 = vpop.f32.mrf.mxu1 }
 0x4ca   : > { %v3033_v21 = vmul.f32 %v3029_v51, %v5960_v59  ;;  %v3034_v38 = vmul.f32 %v3032_v56, %v5938_v18  ;;  %v4800_v18 = vld [vmem:[%s6419_s5 + $0x28] sm:$0x1]  ;;  %v4807_v59 = vld [vmem:[%s6421_s7 + $0x20] sm:$0xff] }
 0x4cb   : > { %v6213_v44 = vpop.f32.mrf.mxu1 }
 0x4cc   : > { %v3035_v7 = vmul.f32 %v3033_v21, %v5935_v39  ;;  %v4799_v39 = vld [vmem:[%s6419_s5 + $0x20] sm:$0xff]  ;;  %6534 = vst [vmem:[#allocation5_spill] sm:$0xff] %v6213_v44 }
 0x4cd   : > { %v6215_v28 = vpop.f32.mrf.mxu1 }
 0x4ce   : > { %3071 = vmatprep.subr.mxu0 %v3035_v7  ;;  %6535 = vst [vmem:[#allocation8_spill] sm:$0xff] %v6215_v28 }
 0x4cf   : > { %3072 = vmatpush1.msra.mxu0 %v3034_v38 }
 0x4d0   : > { %4759 = vmatmul.mubr.msk.f32.vlgmr.msra.gmra.mxu0 %vm1660_vm1, %v4758_v58  ;;  %3250 = vmatprep.subr.mxu0 %v6051_v46 }
 0x4d1   : > { %3251 = vmatpush1.msra.mxu0 %v6058_v13  ;;  %3300 = vmatprep.mubr.f32.mxu0 %v6525_v62 }
 0x4d2   : > { %3252 = vmatprep.subr.mxu0 %v6062_v15 }
 0x4d3   : > { %3253 = vmatpush1.msra.mxu0 %v6067_v35 }
 0x4d4   : > { %3254 = vmatprep.subr.mxu0 %v6071_v49 }
 0x4d5   : > { %3255 = vmatpush1.msra.mxu0 %v6079_v55 }
 0x4d6   : > { %3256 = vmatprep.subr.mxu0 %v6083_v3 }
 0x4d7   : > { %3257 = vmatpush1.msra.mxu0 %v6087_v5 }
 0x4d8   : > { %3258 = vmatprep.subr.mxu0 %v6092_v10 }
 0x4d9   : > { %3259 = vmatpush1.msra.mxu0 %v6097_v52 }
 0x4da   : > { %3260 = vmatprep.subr.mxu0 %v6101_v17 }
 0x4db   : > { %3261 = vmatpush1.msra.mxu0 %v6105_v24 }
 0x4dc   : > { %3262 = vmatprep.subr.mxu0 %v6109_v27 }
 0x4dd   : > { %3263 = vmatpush1.msra.mxu0 %v6113_v8  ;;  %v3385_v41 = vpop.f32.mrf.mxu1 }
 0x4de   : > { %3264 = vmatprep.subr.mxu0 %v6117_v36 }
 0x4df   : > { %3265 = vmatpush1.msra.mxu0 %v6121_v43  ;;  %v3387_v25 = vpop.f32.mrf.mxu1 }
 0x4e0   : > { %3266 = vmatprep.subr.mxu0 %v6125_v57 }
 0x4e1   : > { %3267 = vmatpush1.msra.mxu0 %v6129_v47  ;;  %v6217_v30 = vpop.f32.mrf.mxu1 }
 0x4e2   : > { %4801 = vmatmul.mubr.msk.f32.vlgmr.msra.gmra.mxu0 %vm665_vm0, %v4799_v39  ;;  %3449 = vmatprep.subr.mxu0 %v5973_v4  ;;  %v6226_v39 = vpop.permute.xlu0 %3406 }
 0x4e3   : > { %3450 = vmatpush1.msra.mxu0 %v5983_v23  ;;  %3306 = vmatprep.mubr.f32.mxu0 %v6525_v62  ;;  %v6219_v53 = vpop.f32.mrf.mxu1 }
 0x4e4   : > { %3451 = vmatprep.subr.mxu0 %v5986_v34 }
 0x4e5   : > { %3452 = vmatpush1.msra.mxu0 %v5990_v32 }
 0x4e6   : > { %4802 = vmatmul.mubr.msk.f32.gmra.mxu0 %vm665_vm0, %v4800_v18  ;;  %3453 = vmatprep.subr.mxu0 %v5994_v12  ;;  %v6239_v48 = vpop.permute.xlu0 %3426 }
 0x4e7   : > { %3454 = vmatpush1.msra.mxu0 %v5999_v11  ;;  %3499 = vmatprep.mubr.f32.mxu0 %v6525_v62 }
 0x4e8   : > { %3455 = vmatprep.subr.mxu0 %v6003_v42 }
 0x4e9   : > { %3456 = vmatpush1.msra.mxu0 %v6007_v20 }
 0x4ea   : > { %3457 = vmatprep.subr.mxu0 %v6011_v37  ;;  %v3526_v46 = vpop.permute.xlu0 %3525 }
 0x4eb   : > { %3458 = vmatpush1.msra.mxu0 %v6015_v40 }
 0x4ec   : > { %3459 = vmatprep.subr.mxu0 %v6019_v9 }
 0x4ed   : > { %3460 = vmatpush1.msra.mxu0 %v6023_v33 }
 0x4ee   : > { %3461 = vmatprep.subr.mxu0 %v6027_v0 }
 0x4ef   : > { %3462 = vmatpush1.msra.mxu0 %v6031_v16  ;;  %v3600_v61 = vpop.f32.mrf.mxu1 }
 0x4f0   : > { %3463 = vmatprep.subr.mxu0 %v6035_v22  ;;  %v3601_v26 = vadd.f32 %v3600_v61, %v3521_v2 }
 0x4f1   : > { %3464 = vmatpush1.msra.mxu0 %v6039_v1  ;;  %v3602_v29 = vpop.f32.mrf.mxu1 }
 0x4f2   : > { %3465 = vmatprep.subr.mxu0 %v6043_v14  ;;  %v3603_v45 = vadd.f32 %v3602_v29, %v3521_v2 }
 0x4f3   : > { %3466 = vmatpush1.msra.mxu0 %v6047_v19 }
 0x4f4   : > { %4811 = vmatmul.mubr.msk.f32.vlgmr.msra.gmra.mxu0 %vm665_vm0, %v4807_v59  ;;  %v4001_v50 = vcombine.low %v3601_v26, %v3603_v45  ;;  %v4002_v18 = vcombine.high %v3601_v26, %v3603_v45 }
 0x4f5   : > { %3505 = vmatprep.mubr.f32.mxu0 %v6525_v62 }
 0x4f6   : > { %v4009_v56 = vrot.slane %v4001_v50, %v5312_v54 }
 0x4f8   : > { %4812 = vmatmul.mubr.msk.f32.gmra.mxu0 %vm665_vm0, %v4808_v6  ;;  %v4017_v51 = vcombine.high %v4009_v56, %v4009_v56  ;;  %v4025_v7 = vrot.slane %v4009_v56, %v5312_v54  ;;  %v4016_v56 = vrot.slane %v4002_v18, %v5312_v54 }
 0x4f9   : > { %4297 = vmatprep.mubr.f32.mxu0 %v6525_v62 }
 0x4fa   : > { %v4039_v21 = vrot.slane %v4017_v51, %v5312_v54  ;;  %v4047_v59 = vcombine.high %v4025_v7, %v4025_v7  ;;  %v4069_v6 = vrot.slane %v4025_v7, %v5316_v60  ;;  %v4073_v61 = vrot.slane %v4025_v7, %v5319_v63 }
 0x4fc   : > { %v4077_v38 = vrot.slane %v4039_v21, %v5316_v60  ;;  %v4081_v58 = vrot.slane %v4039_v21, %v5319_v63  ;;  %v4049_v51 = vcombine.high %v4039_v21, %v4039_v21  ;;  %v4085_v28 = vrot.slane %v4047_v59, %v5316_v60 }
 0x4fd   : > { %v4089_v44 = vrot.slane %v4047_v59, %v5319_v63  ;;  %v4156_v45 = vmul.f32 %v6129_v47, %v4069_v6  ;;  %v4157_v26 = vmul.f32 %v6125_v57, %v4073_v61 }
 0x4fe   : > { %v4158_v29 = vmul.f32 %v6121_v43, %v4077_v38  ;;  %v4159_v2 = vmul.f32 %v6117_v36, %v4081_v58  ;;  %v3606_v43 = vpop.f32.mrf.mxu1  ;;  %v4018_v36 = vcombine.high %v4016_v56, %v4016_v56  ;;  %v4032_v58 = vrot.slane %v4016_v56, %v5312_v54 }
 0x4ff   : > { %v4093_v21 = vrot.slane %v4049_v51, %v5316_v60  ;;  %v4097_v18 = vrot.slane %v4049_v51, %v5319_v63  ;;  %v4160_v59 = vmul.f32 %v6113_v8, %v4085_v28  ;;  %v4161_v47 = vmul.f32 %v6109_v27, %v4089_v44 }
 0x500   : > { %v4174_v7 = vadd.f32 %v4158_v29, %v4156_v45  ;;  %v4182_v62 = vadd.f32 %v4159_v2, %v4157_v26  ;;  %v3608_v29 = vpop.f32.mrf.mxu1  ;;  %v4046_v45 = vrot.slane %v4018_v36, %v5312_v54  ;;  %v4048_v26 = vcombine.high %v4032_v58, %v4032_v58 }
 0x501   : > { %v4101_v56 = vrot.slane %v4032_v58, %v5316_v60  ;;  %v4105_v13 = vrot.slane %v4032_v58, %v5319_v63  ;;  %v4162_v51 = vmul.f32 %v6105_v24, %v4093_v21  ;;  %v4163_v8 = vmul.f32 %v6101_v17, %v4097_v18 }
 0x502   : > { %v4175_v61 = vadd.f32 %v4174_v7, %v4160_v59  ;;  %v3609_v44 = vadd.f32 %v3608_v29, %v3526_v46  ;;  %v3607_v7 = vadd.f32 %v3606_v43, %v3526_v46  ;;  %v4109_v36 = vrot.slane %v4046_v45, %v5316_v60 }
 0x503   : > { %v4113_v4 = vrot.slane %v4046_v45, %v5319_v63  ;;  %v4117_v58 = vrot.slane %v4048_v26, %v5316_v60  ;;  %v4164_v24 = vmul.f32 %v6097_v52, %v4101_v56  ;;  %v4165_v17 = vmul.f32 %v6092_v10, %v4105_v13 }
 0x504   : > { %v4051_v21 = vcombine.low %v3607_v7, %v3609_v44  ;;  %v4121_v18 = vrot.slane %v4048_v26, %v5319_v63  ;;  %v4166_v52 = vmul.f32 %v6087_v5, %v4109_v36 }
 0x505   : > { %v4168_v13 = vmul.f32 %v6079_v55, %v4117_v58 }
 0x506   : > { %v4058_v56 = vrot.slane %v4051_v21, %v5312_v54 }
 0x590   : > { %v6232_v50 = vpop.f32.mrf.mxu0 }
 0x591   : > { %6536 = vst [vmem:[#allocation9_spill] sm:$0xff] %v6232_v50  ;;  %v4183_v50 = vadd.f32 %v4182_v62, %v4161_v47  ;;  %v4176_v62 = vadd.f32 %v4175_v61, %v4162_v51  ;;  %v4050_v47 = vcombine.high %v4046_v45, %v4046_v45  ;;  %v4167_v45 = vmul.f32 %v6083_v3, %v4113_v4 }
 0x592   : > { %v6241_v38 = vpop.f32.mrf.mxu0 }
 0x593   : > { %6537 = vst [vmem:[#allocation16_spill] sm:$0xff] %v6241_v38  ;;  %v4184_v59 = vadd.f32 %v4183_v50, %v4163_v8  ;;  %v4177_v50 = vadd.f32 %v4176_v62, %v4164_v24  ;;  %v4129_v44 = vrot.slane %v4050_v47, %v5319_v63 }
 0x595   : > { %v6289_v58 = vmul.f32 %v6062_v15, %v4129_v44  ;;  %v3422_v15 = vpop.permute.xlu1 %3421 }
 0x5a2   : > { %v3302_v6 = vpop.f32.mrf.mxu0 }
 0x5a3   : > { %v3386_v57 = vadd.f32 %v3385_v41, %v3302_v6 }
 0x5a4   : > { %v3304_v2 = vpop.f32.mrf.mxu0 }
 0x5a5   : > { %v3388_v38 = vadd.f32 %v3387_v25, %v3304_v2  ;;  %v3409_v28 = vadd.f32 %v3402_v31, %v3386_v57  ;;  %v4125_v57 = vrot.slane %v4050_v47, %v5316_v60 }
 0x5a6   : > { %v3308_v27 = vpop.f32.mrf.mxu0 }
 0x5a7   : > { %v3410_v41 = vadd.f32 %v3402_v31, %v3388_v38  ;;  %v4185_v38 = vadd.f32 %v4184_v59, %v4165_v17  ;;  %v3392_v8 = vadd.f32 %v6217_v30, %v3308_v27  ;;  %v4169_v30 = vmul.f32 %v6071_v49, %v4121_v18 }
 0x5a8   : > { %v3310_v2 = vpop.f32.mrf.mxu0  ;;  %v6280_v27 = vmul.f32 %v6067_v35, %v4125_v57  ;;  %v6283_v59 = vrot.slane %v4058_v56, %v5312_v54 }
 0x5a9   : > { %v3615_v25 = vcombine.low %v3409_v28, %v3410_v41  ;;  %v3616_v6 = vcombine.high %v3409_v28, %v3410_v41  ;;  %v3394_v43 = vadd.f32 %v6219_v53, %v3310_v2  ;;  %v4186_v28 = vadd.f32 %v4185_v38, %v4167_v45 }
 0x5aa   : > { %v4178_v41 = vadd.f32 %v4177_v50, %v4166_v52 }
 0x5ab   : > { %v3623_v31 = vrot.slane %v3615_v25, %v5312_v54  ;;  %v3630_v46 = vrot.slane %v3616_v6, %v5312_v54  ;;  %v3412_v26 = vadd.f32 %v6226_v39, %v3394_v43  ;;  %v3411_v25 = vadd.f32 %v6226_v39, %v3392_v8 }
 0x5ac   : > { %v6291_v24 = vadd.f32 %v4186_v28, %v4169_v30  ;;  %v6293_v49 = vadd.f32 %v4178_v41, %v4168_v13 }
 0x5ad   : > { %v3631_v61 = vcombine.high %v3623_v31, %v3623_v31  ;;  %v3639_v29 = vrot.slane %v3623_v31, %v5312_v54  ;;  %v3632_v10 = vcombine.high %v3630_v46, %v3630_v46  ;;  %v3646_v5 = vrot.slane %v3630_v46, %v5312_v54 }
 0x5ae   : > { %v3665_v31 = vcombine.low %v3411_v25, %v3412_v26 }
 0x5af   : > { %v3653_v51 = vrot.slane %v3631_v61, %v5312_v54  ;;  %v3661_v53 = vcombine.high %v3639_v29, %v3639_v29  ;;  %v3683_v55 = vrot.slane %v3639_v29, %v5316_v60  ;;  %v3660_v3 = vrot.slane %v3632_v10, %v5312_v54 }
 0x5b0   : > { %v3687_v7 = vrot.slane %v3639_v29, %v5319_v63  ;;  %v3662_v35 = vcombine.high %v3646_v5, %v3646_v5  ;;  %v3715_v39 = vrot.slane %v3646_v5, %v5316_v60  ;;  %v3719_v52 = vrot.slane %v3646_v5, %v5319_v63 }
 0x5b1   : > { %v3691_v62 = vrot.slane %v3653_v51, %v5316_v60  ;;  %v3695_v4 = vrot.slane %v3653_v51, %v5319_v63  ;;  %v3663_v47 = vcombine.high %v3653_v51, %v3653_v51  ;;  %v3699_v36 = vrot.slane %v3661_v53, %v5316_v60 }
 0x5b2   : > { %v3770_v17 = vmul.f32 %v6047_v19, %v3683_v55  ;;  %v3664_v46 = vcombine.high %v3660_v3, %v3660_v3  ;;  %v3703_v50 = vrot.slane %v3661_v53, %v5319_v63  ;;  %v3771_v43 = vmul.f32 %v6043_v14, %v3687_v7 }
 0x5b3   : > { %v3772_v6 = vmul.f32 %v6039_v1, %v3691_v62  ;;  %v3773_v21 = vmul.f32 %v6035_v22, %v3695_v4  ;;  %v3707_v18 = vrot.slane %v3663_v47, %v5316_v60  ;;  %v3711_v57 = vrot.slane %v3663_v47, %v5319_v63 }
 0x5b4   : > { %v3501_v2 = vpop.f32.mrf.mxu0  ;;  %v3774_v61 = vmul.f32 %v6031_v16, %v3699_v36  ;;  %v3723_v51 = vrot.slane %v3660_v3, %v5316_v60  ;;  %v3727_v53 = vrot.slane %v3660_v3, %v5319_v63  ;;  %v3731_v8 = vrot.slane %v3662_v35, %v5316_v60 }
 0x5b5   : > { %v3788_v29 = vadd.f32 %v3772_v6, %v3770_v17  ;;  %v3796_v13 = vadd.f32 %v3773_v21, %v3771_v43  ;;  %v3502_v10 = vadd.f32 %v3501_v2, %v3422_v15  ;;  %v3735_v44 = vrot.slane %v3662_v35, %v5319_v63 }
 0x5b6   : > { %v3503_v38 = vpop.f32.mrf.mxu0  ;;  %v3775_v28 = vmul.f32 %v6027_v0, %v3703_v50  ;;  %v3739_v5 = vrot.slane %v3664_v46, %v5316_v60  ;;  %v3776_v4 = vmul.f32 %v6023_v33, %v3707_v18  ;;  %v3777_v7 = vmul.f32 %v6019_v9, %v3711_v57 }
 0x5b7   : > { %v3504_v45 = vadd.f32 %v3503_v38, %v3422_v15  ;;  %v3789_v26 = vadd.f32 %v3788_v29, %v3774_v61  ;;  %v3672_v30 = vrot.slane %v3665_v31, %v5312_v54  ;;  %v3778_v3 = vmul.f32 %v6015_v40, %v3715_v39 }
 0x5b8   : > { %v3507_v56 = vpop.f32.mrf.mxu0  ;;  %v3797_v47 = vadd.f32 %v3796_v13, %v3775_v28  ;;  %v3779_v6 = vmul.f32 %v6011_v37, %v3719_v52  ;;  %v3743_v17 = vrot.slane %v3664_v46, %v5319_v63  ;;  %v3780_v21 = vmul.f32 %v6007_v20, %v3723_v51 }
 0x5b9   : > { %v3808_v41 = vcombine.low %v3502_v10, %v3504_v45  ;;  %v3809_v55 = vcombine.high %v3502_v10, %v3504_v45  ;;  %v3790_v2 = vadd.f32 %v3789_v26, %v3776_v4  ;;  %v3781_v50 = vmul.f32 %v6003_v42, %v3727_v53 }
 0x5ba   : > { %v3509_v62 = vpop.f32.mrf.mxu0  ;;  %v3782_v39 = vmul.f32 %v5999_v11, %v3731_v8  ;;  %v6324_v38 = vrot.slane %v3672_v30, %v5312_v54  ;;  %v3508_v18 = vadd.f32 %v3507_v56, %v6239_v48  ;;  %v3798_v57 = vadd.f32 %v3797_v47, %v3777_v7 }
 0x5bb   : > { %v3816_v36 = vrot.slane %v3808_v41, %v5312_v54  ;;  %v3823_v25 = vrot.slane %v3809_v55, %v5312_v54  ;;  %v3510_v35 = vadd.f32 %v3509_v62, %v6239_v48  ;;  %v3783_v46 = vmul.f32 %v5994_v12, %v3735_v44 }
 0x5bc   : > { %v3791_v52 = vadd.f32 %v3790_v2, %v3778_v3  ;;  %v3785_v45 = vmul.f32 %v5986_v34, %v3743_v17  ;;  %v3747_v48 = vrot.slane %v6324_v38, %v5316_v60  ;;  %v3784_v28 = vmul.f32 %v5990_v32, %v3739_v5 }
 0x5bd   : > { %v3824_v43 = vcombine.high %v3816_v36, %v3816_v36  ;;  %v3832_v31 = vrot.slane %v3816_v36, %v5312_v54  ;;  %v3825_v15 = vcombine.high %v3823_v25, %v3823_v25  ;;  %v3858_v10 = vcombine.low %v3508_v18, %v3510_v35 }
 0x5be   : > { %v3839_v56 = vrot.slane %v3823_v25, %v5312_v54  ;;  %v3799_v41 = vadd.f32 %v3798_v57, %v3779_v6  ;;  %v3751_v55 = vrot.slane %v6324_v38, %v5319_v63  ;;  %v3792_v7 = vadd.f32 %v3791_v52, %v3780_v21 }
 0x5bf   : > { %v3846_v61 = vrot.slane %v3824_v43, %v5312_v54  ;;  %v3854_v29 = vcombine.high %v3832_v31, %v3832_v31  ;;  %v3876_v13 = vrot.slane %v3832_v31, %v5316_v60  ;;  %v3880_v53 = vrot.slane %v3832_v31, %v5319_v63 }
 0x5c0   : > { %v3853_v44 = vrot.slane %v3825_v15, %v5312_v54  ;;  %v3865_v47 = vrot.slane %v3858_v10, %v5312_v54  ;;  %v3855_v2 = vcombine.high %v3839_v56, %v3839_v56  ;;  %v3908_v17 = vrot.slane %v3839_v56, %v5316_v60 }
 0x5c1   : > { %v3856_v51 = vcombine.high %v3846_v61, %v3846_v61  ;;  %v3884_v8 = vrot.slane %v3846_v61, %v5316_v60  ;;  %v3888_v26 = vrot.slane %v3846_v61, %v5319_v63  ;;  %v3892_v62 = vrot.slane %v3854_v29, %v5316_v60 }
 0x5c2   : > { %v3896_v4 = vrot.slane %v3854_v29, %v5319_v63  ;;  %v3963_v25 = vmul.f32 %v6047_v19, %v3876_v13  ;;  %v3964_v5 = vmul.f32 %v6043_v14, %v3880_v53  ;;  %v3857_v35 = vcombine.high %v3853_v44, %v3853_v44 }
 0x5c3   : > { %v3900_v30 = vrot.slane %v3856_v51, %v5316_v60  ;;  %v3965_v3 = vmul.f32 %v6039_v1, %v3884_v8  ;;  %v3904_v36 = vrot.slane %v3856_v51, %v5319_v63  ;;  %v3966_v6 = vmul.f32 %v6035_v22, %v3888_v26 }
 0x5c4   : > { %v3912_v21 = vrot.slane %v3839_v56, %v5319_v63  ;;  %v3967_v43 = vmul.f32 %v6031_v16, %v3892_v62  ;;  %v3968_v1 = vmul.f32 %v6027_v0, %v3896_v4  ;;  %v3916_v15 = vrot.slane %v3853_v44, %v5316_v60 }
 0x5c5   : > { %v3981_v31 = vadd.f32 %v3965_v3, %v3963_v25  ;;  %v3989_v38 = vadd.f32 %v3966_v6, %v3964_v5  ;;  %v3920_v19 = vrot.slane %v3853_v44, %v5319_v63  ;;  %v3969_v14 = vmul.f32 %v6023_v33, %v3900_v30 }
 0x5c6   : > { %v3800_v18 = vadd.f32 %v3799_v41, %v3781_v50  ;;  %v3970_v22 = vmul.f32 %v6019_v9, %v3904_v36  ;;  %v3793_v29 = vadd.f32 %v3792_v7, %v3782_v39  ;;  %v3924_v52 = vrot.slane %v3855_v2, %v5316_v60 }
 0x5c7   : > { %v3982_v57 = vadd.f32 %v3981_v31, %v3967_v43  ;;  %v3990_v61 = vadd.f32 %v3989_v38, %v3968_v1  ;;  %v3928_v16 = vrot.slane %v3855_v2, %v5319_v63  ;;  %v3971_v0 = vmul.f32 %v6015_v40, %v3908_v17  ;;  %v4888_v43 = vld [vmem:[%s5503_s22] sm:$0xff]  ;;  %v4214_v38 = vpop.trf.xlu0 }
 0x5c8   : > { %v3801_v13 = vadd.f32 %v3800_v18, %v3783_v46  ;;  %v3972_v10 = vmul.f32 %v6011_v37, %v3912_v21  ;;  %v3872_v8 = vrot.slane %v3865_v47, %v5312_v54  ;;  %v3932_v33 = vrot.slane %v3857_v35, %v5316_v60  ;;  %v6538_v46 = vld [vmem:[#allocation2_spill] sm:$0xff] }
 0x5c9   : > { %v3983_v51 = vadd.f32 %v3982_v57, %v3969_v14  ;;  %v3991_v53 = vadd.f32 %v3990_v61, %v3970_v22  ;;  %v3973_v9 = vmul.f32 %v6007_v20, %v3916_v15  ;;  %v3974_v50 = vmul.f32 %v6003_v42, %v3920_v19 }
 0x5ca   : > { %v3936_v39 = vrot.slane %v3857_v35, %v5319_v63  ;;  %v3802_v44 = vadd.f32 %v3801_v13, %v3785_v45  ;;  %v3794_v41 = vadd.f32 %v3793_v29, %v3784_v28  ;;  %v3786_v40 = vmul.f32 %v5983_v23, %v3747_v48  ;;  %v4887_v35 = vld [vmem:[%s5503_s22 + $0x8] sm:$0xff]  ;;  %v6542_v13 = vld [vmem:[#allocation17_spill] sm:$0xff] }
 0x5cb   : > { %v3984_v26 = vadd.f32 %v3983_v51, %v3971_v0  ;;  %v3992_v56 = vadd.f32 %v3991_v53, %v3972_v10  ;;  %v3975_v37 = vmul.f32 %v5999_v11, %v3924_v52  ;;  %v3787_v62 = vmul.f32 %v6538_v46, %v3751_v55 }
 0x5cc   : > { %v3976_v54 = vmul.f32 %v5994_v12, %v3928_v16  ;;  %v3940_v7 = vrot.slane %v3872_v8, %v5316_v60  ;;  %v3944_v20 = vrot.slane %v3872_v8, %v5319_v63  ;;  %v4133_v30 = vrot.slane %v6283_v59, %v5316_v60 }
 0x5cd   : > { %v3985_v4 = vadd.f32 %v3984_v26, %v3973_v9  ;;  %v3993_v42 = vadd.f32 %v3992_v56, %v3974_v50  ;;  %v4137_v45 = vrot.slane %v6283_v59, %v5319_v63  ;;  %v3978_v48 = vmul.f32 %v5986_v34, %v3936_v39  ;;  %v6539_v34 = vld [vmem:[#allocation6_spill] sm:$0xff]  ;;  %v4824_v50 = vld [vmem:[%s6425_s11 + $0x10] sm:$0xff]  ;;  %v6543_v39 = vld [vmem:[#allocation9_spill] sm:$0xff] }
 0x5ce   : > { %v3977_v11 = vmul.f32 %v5990_v32, %v3932_v33  ;;  %v3803_v28 = vadd.f32 %v3802_v44, %v3787_v62  ;;  %v3795_v55 = vadd.f32 %v3794_v41, %v3786_v40  ;;  %v4188_v47 = vadd.f32 %v6291_v24, %v6289_v58  ;;  %v6540_v32 = vld [vmem:[#allocation12_spill] sm:$0xff]  ;;  %v6544_v26 = vld [vmem:[#allocation5_spill] sm:$0xff]  ;;  %v4476_v62 = vpop.permute.xlu1 %4475 }
 0x5cf   : > { %v3994_v12 = vadd.f32 %v3993_v42, %v3976_v54  ;;  %v3986_v3 = vadd.f32 %v3985_v4, %v3975_v37  ;;  %v4180_v36 = vadd.f32 %v6293_v49, %v6280_v27  ;;  %v3979_v60 = vmul.f32 %v5983_v23, %v3940_v7  ;;  %v6545_v41 = vld [vmem:[#allocation16_spill] sm:$0xff] }
 0x5d0   : > { %v3980_v63 = vmul.f32 %v6538_v46, %v3944_v20  ;;  %v4172_v5 = vmul.f32 %v6539_v34, %v4133_v30  ;;  %v4173_v6 = vmul.f32 %v6540_v32, %v4137_v45  ;;  %v4191_v17 = vmul.f32 %v4887_v35, %v3803_v28  ;;  %v6546_v40 = vld [vmem:[#allocation8_spill] sm:$0xff] }
 0x5d1   : > { %v3995_v59 = vadd.f32 %v3994_v12, %v3978_v48  ;;  %v3987_v25 = vadd.f32 %v3986_v3, %v3977_v11  ;;  %v4190_v1 = vmul.f32 %v4888_v43, %v3795_v55  ;;  %v6541_v15 = vmov 0.0  }
 0x5d2   : > { %v4189_v58 = vadd.f32 %v4188_v47, %v4173_v6  ;;  %v4181_v31 = vadd.f32 %v4180_v36, %v4172_v5  ;;  %v3182_v56 = vadd.f32 %v6544_v26, %v6543_v39  ;;  %v3184_v37 = vadd.f32 %v6546_v40, %v6545_v41 }
 0x5d3   : > { %v3996_v2 = vadd.f32 %v3995_v59, %v3980_v63  ;;  %v3988_v21 = vadd.f32 %v3987_v25, %v3979_v60 }
 0x5d5   : > { %v4193_v24 = vadd.f32 %v4191_v17, %v3996_v2  ;;  %v4192_v27 = vadd.f32 %v4190_v1, %v3988_v21 }
 0x5d7   : > { %v4195_v49 = vadd.f32 %v4193_v24, %v4189_v58  ;;  %v4194_v23 = vadd.f32 %v4192_v27, %v4181_v31 }
 0x5d9   : > { %4263 = vmatprep.subr.mxu0 %v4195_v49 }
 0x5da   : > { %4264 = vmatpush1.msra.mxu0 %v4194_v23 }
 0x5db   : > { %4820 = vmatmul.mubr.msk.f32.vlgmr.msra.gmra.mxu0 %vm1660_vm1, %v4214_v38 }
 0x5dc   : > { %4463 = vmatprep.mubr.f32.mxu0 %v6541_v15 }
 0x69b   : > { %v4299_v19 = vpop.f32.mrf.mxu0 }
 0x69c   : > { %v4821_v14 = vmul.f32 -1.442695, %v4299_v19 }
 0x69d   : > { %v4301_v18 = vpop.f32.mrf.mxu0 }
 0x69e   : > { %4878 = vpow2.f32 %v4821_v14  ;;  %v4822_v22 = vmul.f32 -1.442695, %v4301_v18 }
 0x6a0   : > { %4880 = vpow2.f32 %v4822_v22 }
 0x6ab   : > { %v4879_v57 = vpop.eup %4878 }
 0x6ac   : > { %v4310_v29 = vadd.f32 1.0, %v4879_v57 }
 0x6ad   : > { %v4881_v61 = vpop.eup %4880 }
 0x6ae   : > { %v4311_v52 = vadd.f32 1.0, %v4881_v61 }
 0x6b0   : > { %4882 = vrcp.f32 %v4311_v52 }
 0x6b1   : > { %4884 = vrcp.f32 %v4310_v29 }
 0x6bd   : > { %v4883_v16 = vpop.eup %4882 }
 0x6be   : > { %v4885_v0 = vpop.eup %4884  ;;  %4349 = vmatprep.subr.mxu1 %v4883_v16 }
 0x6bf   : > { %4350 = vmatpush1.msra.mxu1 %v4885_v0 }
 0x6c0   : > { %4823 = vmatmul.mubr.msk.f32.vlgmr.msra.gmra.mxu1 %vm1660_vm1, %v6542_v13 }
 0x780   : > { %v4385_v10 = vpop.f32.mrf.mxu1 }
 0x781   : > { %v4390_v51 = vmul.f32 %v4385_v10, %v4194_v23 }
 0x782   : > { %v4387_v53 = vpop.f32.mrf.mxu1 }
 0x783   : > { %v4391_v8 = vmul.f32 %v4387_v53, %v4195_v49  ;;  %v4392_v9 = vmul.f32 %v4390_v51, %v3795_v55 }
 0x785   : > { %v4393_v33 = vmul.f32 %v4391_v8, %v3803_v28 }
 0x787   : > { %4429 = vmatprep.subr.mxu0 %v4393_v33 }
 0x788   : > { %4430 = vmatpush1.msra.mxu0 %v4392_v9 }
 0x789   : > { %4825 = vmatmul.mubr.msk.f32.vlgmr.msra.gmra.mxu0 %vm1660_vm1, %v4824_v50 }
 0x849   : > { %v4465_v44 = vpop.f32.mrf.mxu0 }
 0x84a   : > { %v4470_v46 = vadd.f32 %v4465_v44, %v3182_v56 }
 0x84b   : > { %v4467_v54 = vpop.f32.mrf.mxu0 }
 0x84c   : > { %v4478_v4 = vadd.f32 %v4476_v62, %v4470_v46  ;;  %v4471_v7 = vadd.f32 %v4467_v54, %v3184_v37 }
 0x84e   : > { %v4480_v20 = vmax.f32 %v4478_v4, 0.0  ;;  %v4479_v42 = vadd.f32 %v4476_v62, %v4471_v7 }
 0x850   : > { %4482 = vst [vmem:[%s611_s24] sm:$0xff] %v4480_v20  ;;  %v4481_v30 = vmax.f32 %v4479_v42, 0.0 }
 0x852   : > { %4483 = vst [vmem:[%s611_s24 + $0x8] sm:$0xff] %v4481_v30 }
 0x853 PF: > { %s25_s15 = sadd.s32 1, %s4911_s15   ;;  %s6547_s29 = smov %s4907_s30 }
 0x854   : > { %p22_p5 = scmp.ge.s32.totalorder %s25_s15, 4   ;;  %s6548_s30 = smov %s6550_s16 }
 0x856   :  { %24 = sbr.rel (!%p22_p5) target bundleno = 2 (0x2), region = 145 }

</bundles_post_ra>
